<compile_context>
chip_gen: v7x
topology: tpu7x:2x2x1
jax: 0.10.0
libtpu: 0.0.40
codegen_flags: <defaults>
</compile_context>

<pallas_src>
import functools

import jax
import jax.numpy as jnp
from jax.experimental import pallas as pl
from jax.experimental.pallas import tpu as pltpu


def _round_up(v, m):
    return (v + m - 1) // m * m


def _conv_t3d_kernel(xu_ref, w_ref, o_ref, acc_ref, *, Kd, Kh, Do, Ho, Cout):
    """One batch element per grid step.

    xu_ref : (1, Dp, Hp, Wo_pad, Kp)  bf16  kw-unfolded, zero-padded input
    w_ref  : (Kd, Kp, L)              bf16  flipped kernel, Kh folded into lanes
    o_ref  : (1, Do, Ho*Wo_pad, L)          output volume for this batch element
    acc_ref: (Ho*Wo_pad, L)           f32   VMEM accumulator scratch
    """
    Hp = xu_ref.shape[2]
    Wp = xu_ref.shape[3]        # Wo_pad (multiple of 8)
    Kp = xu_ref.shape[4]
    L = w_ref.shape[2]          # folded output-lane width (128 here)
    M = Ho * Wp
    MP = Hp * Wp

    def od_body(od, carry):
        # Kd bf16 MXU matmuls of (MP, Kp) x (Kp, L) with f32 accumulation.
        # Tap kh of the result lives in output lanes [kh*Cout, (kh+1)*Cout)
        # at a kh*Wp sublane row offset: realign with a sublane-aligned slice
        # + static lane roll (XLU) and accumulate on the VPU.  Lanes >= Cout
        # collect garbage partial sums; the wrapper's [:Cout] slice strips them.
        for kd in range(Kd):
            a = xu_ref[0, od + kd, :, :, :].reshape(MP, Kp)
            r = jnp.dot(a, w_ref[kd], preferred_element_type=jnp.float32)
            upd = r[0:M, :]                         # kh == 0 tap, no roll
            for kh in range(1, Kh):
                blk = r[kh * Wp:kh * Wp + M, :]     # start % 8 == 0 (Wp % 8 == 0)
                upd = upd + pltpu.roll(blk, (L - kh * Cout) % L, 1)
            if kd == 0:
                acc_ref[...] = upd                  # init from first tap group
            else:
                acc_ref[...] = acc_ref[...] + upd
        o_ref[0, od] = acc_ref[...].astype(o_ref.dtype)
        return carry

    # fori_loop (not a Python for) so per-od live ranges stay bounded.
    jax.lax.fori_loop(0, Do, od_body, 0)


def conv_transpose3d(x, weight, stride=(1, 1, 1), padding=(0, 0, 0),
                     output_padding=(0, 0, 0), groups=1):
    """x: (N, Cin, D, H, W); weight: (Cin, Cout, Kd, Kh, Kw) -> (N, Cout, Do, Ho, Wo)."""
    assert stride == (1, 1, 1) and padding == (0, 0, 0)
    assert output_padding == (0, 0, 0) and groups == 1
    N, Cin, D, H, W = x.shape
    Cin_w, Cout, Kd, Kh, Kw = weight.shape
    assert Cin == Cin_w
    Do, Ho, Wo = D + Kd - 1, H + Kh - 1, W + Kw - 1

    out_dtype = x.dtype
    Wo_pad = _round_up(Wo, 8)            # sublane-aligned spatial tile
    Kp = _round_up(Kw * Cin, 128)        # lane-dense contraction depth
    L = _round_up(Kh * Cout, 128)        # Kh*Cout folded output lanes
    Dp = D + 2 * (Kd - 1)
    Hp = H + 2 * (Kh - 1)
    M = Ho * Wo_pad

    # ---- wrapper-side glue (plain JAX) -------------------------------------
    # bf16 before any data movement: halves the HBM bytes of every pass below
    # and feeds the MXU its native dtype (accumulation stays f32 in-kernel).
    xb = x.astype(jnp.bfloat16)
    x_ndhwc = jnp.transpose(xb, (0, 2, 3, 4, 1))
    # Pad so that every kw-shifted window of width Wo_pad stays in-bounds.
    x_pad = jnp.pad(
        x_ndhwc,
        ((0, 0), (Kd - 1, Kd - 1), (Kh - 1, Kh - 1),
         (Kw - 1, Wo_pad - W), (0, 0)),
    )
    # kw-unfold (kw-major, ci-minor); K-padding folded into the same concat so
    # the whole input path is transpose + pad + one fused concatenate.
    parts = [x_pad[:, :, :, kw:kw + Wo_pad, :] for kw in range(Kw)]
    if Kp > Kw * Cin:
        parts.append(jnp.zeros((N, Dp, Hp, Wo_pad, Kp - Kw * Cin), jnp.bfloat16))
    x_unf = jnp.concatenate(parts, axis=-1)     # (N, Dp, Hp, Wo_pad, Kp)

    # Spatially flipped kernel with Kh folded into the output-lane dimension:
    #   wf[kd, kw*Cin+ci, kh*Cout+co] = weight[ci, co, Kd-1-kd, Kh-1-kh, Kw-1-kw]
    w_flip = jnp.transpose(weight[:, :, ::-1, ::-1, ::-1], (2, 3, 4, 0, 1))
    w2 = jnp.transpose(w_flip, (0, 2, 3, 1, 4)).reshape(Kd, Kw * Cin, Kh * Cout)
    wf = jnp.pad(w2, ((0, 0), (0, Kp - Kw * Cin), (0, L - Kh * Cout)))
    wf = wf.astype(jnp.bfloat16)

    kernel = functools.partial(_conv_t3d_kernel, Kd=Kd, Kh=Kh, Do=Do, Ho=Ho,
                               Cout=Cout)

    # TODO(synk): for production-scale D/H/W (v7x: 64 MiB VMEM) block the grid
    # over D with a (Kd-1) halo and split Do onto a second "parallel" grid axis
    # so both v7x TensorCores stay busy when N == 1.
    # TODO(synk): on v6e/v7x fold Kd into the lanes as well (Kd*Kh*Cout -> 256)
    # to match the 256-wide MXU output and cut the matmul count another 3x.
    out_p = pl.pallas_call(
        kernel,
        out_shape=jax.ShapeDtypeStruct((N, Do, M, L), out_dtype),
        grid_spec=pltpu.PrefetchScalarGridSpec(
            num_scalar_prefetch=0,
            grid=(N,),
            in_specs=[
                # Full kw-unfolded volume for batch n (~1 MiB bf16 at these
                # shapes), double-buffered by the pipeline.
                pl.BlockSpec((1, Dp, Hp, Wo_pad, Kp),
                             lambda n: (n, 0, 0, 0, 0)),
                # Folded weight (~0.2 MiB bf16), resident across the grid.
                pl.BlockSpec((Kd, Kp, L), lambda n: (0, 0, 0)),
            ],
            out_specs=pl.BlockSpec((1, Do, M, L), lambda n: (n, 0, 0, 0)),
            scratch_shapes=[pltpu.VMEM((M, L), jnp.float32)],
        ),
        compiler_params=pltpu.CompilerParams(
            dimension_semantics=("parallel",)),
    )(x_unf, wf)

    # Strip the spatial W padding and the Kh-fold lane garbage; back to NCDHW.
    out = out_p.reshape(N, Do, Ho, Wo_pad, L)[:, :, :, :Wo, :Cout]
    return jnp.transpose(out, (0, 4, 1, 2, 3))


if __name__ == "__main__":
    key = jax.random.PRNGKey(0)
    k1, k2 = jax.random.split(key)

    # Module config: in_channels=32, out_channels=16, kernel=(3,5,7),
    # stride/pad/output_pad zero, groups=1, bias=False.
    N, Cin, Cout = 2, 32, 16
    Kd, Kh, Kw = 3, 5, 7
    D, H, W = 5, 6, 8  # small asymmetric input

    x = jax.random.normal(k1, (N, Cin, D, H, W), jnp.float32)
    fan_in = Cin * Kd * Kh * Kw
    weight = jax.random.normal(k2, (Cin, Cout, Kd, Kh, Kw), jnp.float32) * (
        1.0 / (fan_in ** 0.5)
    )

    out = conv_transpose3d(x, weight,
                           stride=(1, 1, 1), padding=(0, 0, 0),
                           output_padding=(0, 0, 0), groups=1)
    out = jax.block_until_ready(out)
    assert out.shape == (N, Cout, D + Kd - 1, H + Kh - 1, W + Kw - 1)

    # Reference: transposed conv (stride 1, pad 0) == full conv with flipped
    # kernel and swapped channel axes.  Kernel uses bf16 operands with f32
    # accumulation -> stays well inside the 1e-2 relative tolerance.
    rhs = jnp.transpose(weight[:, :, ::-1, ::-1, ::-1], (1, 0, 2, 3, 4))  # OIDHW
    ref = jax.lax.conv_general_dilated(
        x, rhs, window_strides=(1, 1, 1),
        padding=[(Kd - 1, Kd - 1), (Kh - 1, Kh - 1), (Kw - 1, Kw - 1)],
        dimension_numbers=("NCDHW", "OIDHW", "NCDHW"),
        precision=jax.lax.Precision.HIGHEST,
    )
    err = float(jnp.max(jnp.abs(out - ref)))
    scale = float(jnp.max(jnp.abs(ref))) + 1.0
    assert err <= 1e-2 * scale, f"max abs err {err} (scale {scale})"

    print("KERNEL_OK")
</pallas_src>

<mosaic_0001>
module attributes {stable_mosaic.version = 11 : i64} {
  func.func @_conv_t3d_kernel(%arg0: i32, %arg1: memref<1x9x14x16x256xbf16, #tpu.memory_space<vmem>>, %arg2: memref<3x256x128xbf16, #tpu.memory_space<vmem>>, %arg3: memref<1x7x160x128xf32, #tpu.memory_space<vmem>>, %arg4: memref<160x128xf32, #tpu.memory_space<vmem>>) attributes {dimension_semantics = [#tpu.dimension_semantics<parallel>], iteration_bounds = array<i64: 2>, scalar_prefetch = 0 : i64, scratch_operands = 1 : i64, tpu.core_type = #tpu.core_type<tc>, window_params = [{transform_indices = @transform_0, window_bounds = array<i64: 1, 9, 14, 16, 256>}, {pipeline_mode = #tpu.pipeline_mode<synchronous>, transform_indices = @transform_1, window_bounds = array<i64: 3, 256, 128>}, {transform_indices = @transform_2, window_bounds = array<i64: 1, 7, 160, 128>}]} {
    %c0_i32 = arith.constant 0 : i32
    %c7_i32 = arith.constant 7 : i32
    %0 = arith.addi %c0_i32, %c7_i32 : i32
    %c1_i32 = arith.constant 1 : i32
    scf.for %arg5 = %c0_i32 to %0 step %c1_i32  : i32 {
      %c0_i32_1 = arith.constant 0 : i32
      %1 = arith.addi %arg5, %c0_i32_1 : i32
      %c0 = arith.constant 0 : index
      %2 = arith.index_cast %1 : i32 to index
      %c0_2 = arith.constant 0 : index
      %c0_3 = arith.constant 0 : index
      %c0_4 = arith.constant 0 : index
      %3 = vector.load %arg1[%c0, %2, %c0_2, %c0_3, %c0_4] : memref<1x9x14x16x256xbf16, #tpu.memory_space<vmem>>, vector<1x1x14x16x256xbf16>
      %4 = vector.shape_cast %3 : vector<1x1x14x16x256xbf16> to vector<14x16x256xbf16>
      %5 = vector.shape_cast %4 : vector<14x16x256xbf16> to vector<224x256xbf16>
      %c0_5 = arith.constant 0 : index
      %c0_6 = arith.constant 0 : index
      %c0_7 = arith.constant 0 : index
      %6 = vector.load %arg2[%c0_5, %c0_6, %c0_7] : memref<3x256x128xbf16, #tpu.memory_space<vmem>>, vector<1x256x128xbf16>
      %7 = vector.shape_cast %6 : vector<1x256x128xbf16> to vector<256x128xbf16>
      %cst = arith.constant dense<0.000000e+00> : vector<224x128xf32>
      %8 = tpu.matmul %5, %7, %cst {dimension_numbers = #tpu.dot_dimension_numbers<[1], [0], [0], [1], [0, 0, 1, 1], [], []>} : vector<224x256xbf16>, vector<256x128xbf16>, vector<224x128xf32> -> vector<224x128xf32>
      %9 = vector.extract_strided_slice %8 {offsets = [0, 0], sizes = [160, 128], strides = [1, 1]} : vector<224x128xf32> to vector<160x128xf32>
      %10 = vector.extract_strided_slice %8 {offsets = [16, 0], sizes = [160, 128], strides = [1, 1]} : vector<224x128xf32> to vector<160x128xf32>
      %c112_i32 = arith.constant 112 : i32
      %11 = tpu.dynamic_rotate %10 by %c112_i32 dim 1 : vector<160x128xf32>, i32 -> vector<160x128xf32>
      %12 = arith.addf %9, %11 : vector<160x128xf32>
      %13 = vector.extract_strided_slice %8 {offsets = [32, 0], sizes = [160, 128], strides = [1, 1]} : vector<224x128xf32> to vector<160x128xf32>
      %c96_i32 = arith.constant 96 : i32
      %14 = tpu.dynamic_rotate %13 by %c96_i32 dim 1 : vector<160x128xf32>, i32 -> vector<160x128xf32>
      %15 = arith.addf %12, %14 : vector<160x128xf32>
      %16 = vector.extract_strided_slice %8 {offsets = [48, 0], sizes = [160, 128], strides = [1, 1]} : vector<224x128xf32> to vector<160x128xf32>
      %c80_i32 = arith.constant 80 : i32
      %17 = tpu.dynamic_rotate %16 by %c80_i32 dim 1 : vector<160x128xf32>, i32 -> vector<160x128xf32>
      %18 = arith.addf %15, %17 : vector<160x128xf32>
      %19 = vector.extract_strided_slice %8 {offsets = [64, 0], sizes = [160, 128], strides = [1, 1]} : vector<224x128xf32> to vector<160x128xf32>
      %c64_i32 = arith.constant 64 : i32
      %20 = tpu.dynamic_rotate %19 by %c64_i32 dim 1 : vector<160x128xf32>, i32 -> vector<160x128xf32>
      %21 = arith.addf %18, %20 : vector<160x128xf32>
      %c0_8 = arith.constant 0 : index
      %c0_9 = arith.constant 0 : index
      %22 = vector.load %arg4[%c0_8, %c0_9] : memref<160x128xf32, #tpu.memory_space<vmem>>, vector<160x128xf32>
      tpu.vector_store %arg4[%c0_8, %c0_9], %21 {strides = array<i32>} : memref<160x128xf32, #tpu.memory_space<vmem>>, vector<160x128xf32>,
      %c1_i32_10 = arith.constant 1 : i32
      %23 = arith.addi %arg5, %c1_i32_10 : i32
      %c0_11 = arith.constant 0 : index
      %24 = arith.index_cast %23 : i32 to index
      %c0_12 = arith.constant 0 : index
      %c0_13 = arith.constant 0 : index
      %c0_14 = arith.constant 0 : index
      %25 = vector.load %arg1[%c0_11, %24, %c0_12, %c0_13, %c0_14] : memref<1x9x14x16x256xbf16, #tpu.memory_space<vmem>>, vector<1x1x14x16x256xbf16>
      %26 = vector.shape_cast %25 : vector<1x1x14x16x256xbf16> to vector<14x16x256xbf16>
      %27 = vector.shape_cast %26 : vector<14x16x256xbf16> to vector<224x256xbf16>
      %c1 = arith.constant 1 : index
      %c0_15 = arith.constant 0 : index
      %c0_16 = arith.constant 0 : index
      %28 = vector.load %arg2[%c1, %c0_15, %c0_16] : memref<3x256x128xbf16, #tpu.memory_space<vmem>>, vector<1x256x128xbf16>
      %29 = vector.shape_cast %28 : vector<1x256x128xbf16> to vector<256x128xbf16>
      %cst_17 = arith.constant dense<0.000000e+00> : vector<224x128xf32>
      %30 = tpu.matmul %27, %29, %cst_17 {dimension_numbers = #tpu.dot_dimension_numbers<[1], [0], [0], [1], [0, 0, 1, 1], [], []>} : vector<224x256xbf16>, vector<256x128xbf16>, vector<224x128xf32> -> vector<224x128xf32>
      %31 = vector.extract_strided_slice %30 {offsets = [0, 0], sizes = [160, 128], strides = [1, 1]} : vector<224x128xf32> to vector<160x128xf32>
      %32 = vector.extract_strided_slice %30 {offsets = [16, 0], sizes = [160, 128], strides = [1, 1]} : vector<224x128xf32> to vector<160x128xf32>
      %c112_i32_18 = arith.constant 112 : i32
      %33 = tpu.dynamic_rotate %32 by %c112_i32_18 dim 1 : vector<160x128xf32>, i32 -> vector<160x128xf32>
      %34 = arith.addf %31, %33 : vector<160x128xf32>
      %35 = vector.extract_strided_slice %30 {offsets = [32, 0], sizes = [160, 128], strides = [1, 1]} : vector<224x128xf32> to vector<160x128xf32>
      %c96_i32_19 = arith.constant 96 : i32
      %36 = tpu.dynamic_rotate %35 by %c96_i32_19 dim 1 : vector<160x128xf32>, i32 -> vector<160x128xf32>
      %37 = arith.addf %34, %36 : vector<160x128xf32>
      %38 = vector.extract_strided_slice %30 {offsets = [48, 0], sizes = [160, 128], strides = [1, 1]} : vector<224x128xf32> to vector<160x128xf32>
      %c80_i32_20 = arith.constant 80 : i32
      %39 = tpu.dynamic_rotate %38 by %c80_i32_20 dim 1 : vector<160x128xf32>, i32 -> vector<160x128xf32>
      %40 = arith.addf %37, %39 : vector<160x128xf32>
      %41 = vector.extract_strided_slice %30 {offsets = [64, 0], sizes = [160, 128], strides = [1, 1]} : vector<224x128xf32> to vector<160x128xf32>
      %c64_i32_21 = arith.constant 64 : i32
      %42 = tpu.dynamic_rotate %41 by %c64_i32_21 dim 1 : vector<160x128xf32>, i32 -> vector<160x128xf32>
      %43 = arith.addf %40, %42 : vector<160x128xf32>
      %c0_22 = arith.constant 0 : index
      %c0_23 = arith.constant 0 : index
      %44 = vector.load %arg4[%c0_22, %c0_23] : memref<160x128xf32, #tpu.memory_space<vmem>>, vector<160x128xf32>
      %45 = arith.addf %44, %43 : vector<160x128xf32>
      %c0_24 = arith.constant 0 : index
      %c0_25 = arith.constant 0 : index
      %46 = vector.load %arg4[%c0_24, %c0_25] : memref<160x128xf32, #tpu.memory_space<vmem>>, vector<160x128xf32>
      tpu.vector_store %arg4[%c0_24, %c0_25], %45 {strides = array<i32>} : memref<160x128xf32, #tpu.memory_space<vmem>>, vector<160x128xf32>,
      %c2_i32 = arith.constant 2 : i32
      %47 = arith.addi %arg5, %c2_i32 : i32
      %c0_26 = arith.constant 0 : index
      %48 = arith.index_cast %47 : i32 to index
      %c0_27 = arith.constant 0 : index
      %c0_28 = arith.constant 0 : index
      %c0_29 = arith.constant 0 : index
      %49 = vector.load %arg1[%c0_26, %48, %c0_27, %c0_28, %c0_29] : memref<1x9x14x16x256xbf16, #tpu.memory_space<vmem>>, vector<1x1x14x16x256xbf16>
      %50 = vector.shape_cast %49 : vector<1x1x14x16x256xbf16> to vector<14x16x256xbf16>
      %51 = vector.shape_cast %50 : vector<14x16x256xbf16> to vector<224x256xbf16>
      %c2 = arith.constant 2 : index
      %c0_30 = arith.constant 0 : index
      %c0_31 = arith.constant 0 : index
      %52 = vector.load %arg2[%c2, %c0_30, %c0_31] : memref<3x256x128xbf16, #tpu.memory_space<vmem>>, vector<1x256x128xbf16>
      %53 = vector.shape_cast %52 : vector<1x256x128xbf16> to vector<256x128xbf16>
      %cst_32 = arith.constant dense<0.000000e+00> : vector<224x128xf32>
      %54 = tpu.matmul %51, %53, %cst_32 {dimension_numbers = #tpu.dot_dimension_numbers<[1], [0], [0], [1], [0, 0, 1, 1], [], []>} : vector<224x256xbf16>, vector<256x128xbf16>, vector<224x128xf32> -> vector<224x128xf32>
      %55 = vector.extract_strided_slice %54 {offsets = [0, 0], sizes = [160, 128], strides = [1, 1]} : vector<224x128xf32> to vector<160x128xf32>
      %56 = vector.extract_strided_slice %54 {offsets = [16, 0], sizes = [160, 128], strides = [1, 1]} : vector<224x128xf32> to vector<160x128xf32>
      %c112_i32_33 = arith.constant 112 : i32
      %57 = tpu.dynamic_rotate %56 by %c112_i32_33 dim 1 : vector<160x128xf32>, i32 -> vector<160x128xf32>
      %58 = arith.addf %55, %57 : vector<160x128xf32>
      %59 = vector.extract_strided_slice %54 {offsets = [32, 0], sizes = [160, 128], strides = [1, 1]} : vector<224x128xf32> to vector<160x128xf32>
      %c96_i32_34 = arith.constant 96 : i32
      %60 = tpu.dynamic_rotate %59 by %c96_i32_34 dim 1 : vector<160x128xf32>, i32 -> vector<160x128xf32>
      %61 = arith.addf %58, %60 : vector<160x128xf32>
      %62 = vector.extract_strided_slice %54 {offsets = [48, 0], sizes = [160, 128], strides = [1, 1]} : vector<224x128xf32> to vector<160x128xf32>
      %c80_i32_35 = arith.constant 80 : i32
      %63 = tpu.dynamic_rotate %62 by %c80_i32_35 dim 1 : vector<160x128xf32>, i32 -> vector<160x128xf32>
      %64 = arith.addf %61, %63 : vector<160x128xf32>
      %65 = vector.extract_strided_slice %54 {offsets = [64, 0], sizes = [160, 128], strides = [1, 1]} : vector<224x128xf32> to vector<160x128xf32>
      %c64_i32_36 = arith.constant 64 : i32
      %66 = tpu.dynamic_rotate %65 by %c64_i32_36 dim 1 : vector<160x128xf32>, i32 -> vector<160x128xf32>
      %67 = arith.addf %64, %66 : vector<160x128xf32>
      %c0_37 = arith.constant 0 : index
      %c0_38 = arith.constant 0 : index
      %68 = vector.load %arg4[%c0_37, %c0_38] : memref<160x128xf32, #tpu.memory_space<vmem>>, vector<160x128xf32>
      %69 = arith.addf %68, %67 : vector<160x128xf32>
      %c0_39 = arith.constant 0 : index
      %c0_40 = arith.constant 0 : index
      %70 = vector.load %arg4[%c0_39, %c0_40] : memref<160x128xf32, #tpu.memory_space<vmem>>, vector<160x128xf32>
      tpu.vector_store %arg4[%c0_39, %c0_40], %69 {strides = array<i32>} : memref<160x128xf32, #tpu.memory_space<vmem>>, vector<160x128xf32>,
      %c0_41 = arith.constant 0 : index
      %c0_42 = arith.constant 0 : index
      %71 = vector.load %arg4[%c0_41, %c0_42] : memref<160x128xf32, #tpu.memory_space<vmem>>, vector<160x128xf32>
      %c0_43 = arith.constant 0 : index
      %72 = arith.index_cast %arg5 : i32 to index
      %c0_44 = arith.constant 0 : index
      %c0_45 = arith.constant 0 : index
      %73 = vector.load %arg3[%c0_43, %72, %c0_44, %c0_45] : memref<1x7x160x128xf32, #tpu.memory_space<vmem>>, vector<1x1x160x128xf32>
      %74 = vector.shape_cast %73 : vector<1x1x160x128xf32> to vector<160x128xf32>
      %75 = vector.shape_cast %71 : vector<160x128xf32> to vector<1x1x160x128xf32>
      tpu.vector_store %arg3[%c0_43, %72, %c0_44, %c0_45], %75 {strides = array<i32>} : memref<1x7x160x128xf32, #tpu.memory_space<vmem>>, vector<1x1x160x128xf32>,
    }
    %c7_i32_0 = arith.constant 7 : i32
    return
  }
  func.func @transform_0(%arg0: i32) -> (i32, i32, i32, i32, i32) {
    %c0_i32 = arith.constant 0 : i32
    %c0_i32_0 = arith.constant 0 : i32
    %c0_i32_1 = arith.constant 0 : i32
    %c0_i32_2 = arith.constant 0 : i32
    %c0_i32_3 = arith.constant 0 : i32
    return %arg0, %c0_i32, %c0_i32_0, %c0_i32_1, %c0_i32_2 : i32, i32, i32, i32, i32
  }
  func.func @transform_1(%arg0: i32) -> (i32, i32, i32) {
    %c0_i32 = arith.constant 0 : i32
    %c0_i32_0 = arith.constant 0 : i32
    %c0_i32_1 = arith.constant 0 : i32
    %c0_i32_2 = arith.constant 0 : i32
    return %c0_i32, %c0_i32_0, %c0_i32_1 : i32, i32, i32
  }
  func.func @transform_2(%arg0: i32) -> (i32, i32, i32, i32) {
    %c0_i32 = arith.constant 0 : i32
    %c0_i32_0 = arith.constant 0 : i32
    %c0_i32_1 = arith.constant 0 : i32
    %c0_i32_2 = arith.constant 0 : i32
    return %arg0, %c0_i32, %c0_i32_0, %c0_i32_1 : i32, i32, i32, i32
  }
}

</mosaic_0001>

<bundles_post_ra>
// kernel: tpu_custom_call.1
= control target key start
LH: loop header
LB: loop body
LE: loop exit
PB: predicated region body
PF: predicated region fallthrough
CT: control target
= control target key end

     0   :  { %7 = vsyncpa [#allocation4], 0  ;;  %s5054_s0 = inlined_call_operand.hbm [shape: bf16[2,9,14,16,256], index: 0, kind: input, shape index: {}]   ;;  %s5055_s1 = inlined_call_operand.hbm [shape: bf16[3,256,128], index: 1, kind: input, shape index: {}]   ;;  %s5056_s2 = inlined_call_operand.hbm [shape: f32[2,7,160,128], index: 2, kind: output, shape index: {}]  }
   0x1   :  { %9 = vsyncpa [#allocation4 + $0x1], 0 }
   0x2   :  { %10 = vsyncpa [#allocation7], 0 }
   0x3   :  { %11 = vsyncpa [#allocation5], 0 }
   0x4   :  { %13 = vsyncpa [#allocation5 + $0x1], 0  ;;  %s3470_s9 = smov 0   ;;  %s3472_s10 = smov 0  }
   0x5   :  { %s3474_s11 = smov 0   ;;  %s3476_s12 = smov 0  }
   0x6 LB: > { %s3491_s13 = sadd.s32 4294967295, %s3436_s12   ;;  %s2534_s14 = sadd.s32 4294967294, %s3436_s12   ;;  %s3436_s12 = sphi %s3476_s12, %s5452_s12   ;;  %s3432_s11 = sphi %s3474_s11, %s5451_s11   ;;  %s3428_s10 = sphi %s3472_s10, %s5450_s10   ;;  %s3424_s9 = sphi %s3470_s9, %s5449_s9  }
   0x7   : > { %p39_p0 = scmp.ne.s32.totalorder %s3428_s10, %s3424_s9  ;;  %p5057_p1 = scmp.eq.s32.totalorder %s3491_s13, 0 }
   0x8   : > { %p90_p3 = scmp.eq.s32.totalorder %s2534_s14, 1  ;;  %p2535_p5 = scmp.ge.s32.totalorder %s3436_s12, 1 }
   0x9   : > { %p3500_p4 = por %p5057_p1, %p39_p0  ;;  %p97_p7 = scmp.lt.s32.totalorder %s3436_s12, 3 }
   0xa   : > { %p3505_p6 = por %p90_p3, %p39_p0  ;;  %s3442_s18 = smov [#allocation6]  }
   0xb   : > { %s5090_s15 = scalar_select %p3500_p4, 1, 0 }
   0xc   : > { %s5091_s16 = scalar_select %p3505_p6, 1, 0 }
   0xd   : > { %p3510_p8 = pnand %p2535_p5, %p97_p7  ;;  %s109_s19 = sshll.u32 %s3442_s18, 4  ;;  %s3514_s19 = int_to_ptr.vmem [resolvable:$true] %s109_s19 }
   0xe   : > { %s3526_s21 = sadd.s32 1, %s3436_s12   ;;  %s26_s22 = sadd.s32 1, %s3432_s11 }
   0xf   : > { %s5092_s17 = scalar_select %p3510_p8, 1, 0 }
  0x10   : > { %p3063_p9 = pneg %p3510_p8  ;;  %s23_s23 = ssub.s32 %s3436_s12, %s3526_s21 }
  0x11   : > { %s3304_s26 = scalar_lea.hbm %s5055_s1, 6144 }
  0x12   : > { %p3521_p11 = pnand %p3063_p9, %p5057_p1  ;;  %p3305_p12 = scmp.ne.s32.totalorder %s5055_s1, %s3304_s26 }
  0x13   : > { %p3311_p5 = scmp.lt.u32.totalorder %s3304_s26, %s5055_s1 }
  0x14   : > { %p3306_p13 = pneg %p3521_p11 }
  0x16   : > { %p3307_p0 = pnand %p3306_p13, %p3305_p12 }
  0x18   : > { %p3308_p3 = pneg %p3307_p0 }
  0x1a   : > { %p3313_p7 = pnand %p3311_p5, %p3308_p3 }
  0x1c   : > { %3316 = shalt.err (!%p3313_p7)
}
  0x1d   : > { %s3317_s3 = scalar_lea.vmem %s3514_s19, 6144  ;;  %p3325_p2 = scmp.lt.s32.totalorder %s3514_s19, %s3514_s19 }
  0x1e   : > { %p3318_p9 = scmp.ne.s32.totalorder %s3514_s19, %s3317_s3  ;;  %p3326_p6 = scmp.lt.s32.totalorder %s3317_s3, %s3317_s3 }
  0x20   : > { %p3320_p10 = pnand %p3318_p9, %p3306_p13  ;;  %p3327_p4 = por %p3326_p6, %p3325_p2 }
  0x22   : > { %p3321_p1 = pneg %p3320_p10 }
  0x24   : > { %p3328_p8 = pnand %p3327_p4, %p3321_p1 }
  0x26   : > { %3331 = shalt.err (!%p3328_p8)
}
  0x27   : > { %s3443_s4 = smov 64   ;;  %s3444_s5 = smov 4  }
  0x28   : > { %3066 = dma.hbm_to_vmem [thread:$0]  (!%p3521_p11), %s5055_s1, 6144, %s3514_s19, [#allocation7], %s3443_s4, %s3443_s4, %s3444_s5  }
  0x29   : > { %p24_p2 = scmp.eq.s32.totalorder %s23_s23, 0  ;;  %p33_p1 = scmp.ne.s32.totalorder %s3432_s11, %s3428_s10 }
  0x2a   : > { %p34_p4 = scmp.eq.s32.totalorder %s3436_s12, 0  ;;  %p3076_p6 = scmp.lt.s32.totalorder %s3436_s12, 2 }
  0x2b   : > { %s3557_s8 = scalar_select %p24_p2, %s3432_s11, %s26_s22  }
  0x2c   : > { %p35_p8 = por %p34_p4, %p33_p1  ;;  %p5094_p10 = scmp.eq.s32.totalorder %s3491_s13, 1 }
  0x2d   : > { %s123_s18 = sand.u32 1, %s3432_s11   ;;  %s3051_s24 = smul.u32 32256, %s3436_s12 }
  0x2e   : > { %p3561_p12 = por %p5094_p10, %p33_p1  ;;  %s3050_s25 = smul.u32 2016, %s123_s18 }
  0x2f   : > { %s3570_s27 = scalar_lea.hbm %s5054_s0, %s3051_s24  ;;  %p3572_p11 = pnand %p3076_p6, %p35_p8 }
  0x30   : > { %s127_s22 = scalar_lea.vmem [#allocation3], %s3050_s25  ;;  %s3578_s28 = scalar_lea.sflag [#allocation4], %s123_s18 }
  0x31   : > { %s134_s23 = sshll.u32 %s127_s22, 4  ;;  %s3332_s29 = scalar_lea.hbm %s3570_s27, 32256  ;;  %s3576_s23 = int_to_ptr.vmem [resolvable:$true] %s134_s23 }
  0x32   : > { %p3333_p13 = scmp.ne.s32.totalorder %s3570_s27, %s3332_s29  ;;  %p3334_p0 = pneg %p3572_p11 }
  0x33   : > { %s3337_s4 = scalar_lea.hbm %s5054_s0, 64512  ;;  %p3338_p7 = scmp.lt.u32.totalorder %s3570_s27, %s5054_s0 }
  0x34   : > { %p3335_p3 = pnand %p3334_p0, %p3333_p13  ;;  %p3339_p9 = scmp.lt.u32.totalorder %s3337_s4, %s3332_s29 }
  0x35   : > { %p3341_p1 = scmp.lt.u32.totalorder %s3332_s29, %s3570_s27 }
  0x36   : > { %p3336_p5 = pneg %p3335_p3  ;;  %p3340_p2 = por %p3339_p9, %p3338_p7 }
  0x38   : > { %p3342_p4 = por %p3341_p1, %p3340_p2 }
  0x3a   : > { %p3343_p6 = pnand %p3342_p4, %p3336_p5 }
  0x3c   : > { %3346 = shalt.err (!%p3343_p6)
}
  0x3d   : > { %s3347_s7 = scalar_lea.vmem %s3576_s23, 32256  ;;  %s3445_s18 = smov [#allocation3]  }
  0x3e   : > { %p3348_p8 = scmp.ne.s32.totalorder %s3576_s23, %s3347_s7  ;;  %s3352_s24 = sshll.u32 %s3445_s18, 4  ;;  %s3353_s24 = int_to_ptr.vmem [resolvable:$false] %s3352_s24 }
  0x3f   : > { %s3354_s25 = scalar_lea.vmem %s3353_s24, 64512  ;;  %p3355_p3 = scmp.lt.s32.totalorder %s3576_s23, %s3353_s24 }
  0x40   : > { %p3350_p10 = pnand %p3348_p8, %p3334_p0  ;;  %p3356_p7 = scmp.lt.s32.totalorder %s3354_s25, %s3347_s7 }
  0x42   : > { %p3351_p13 = pneg %p3350_p10  ;;  %p3357_p9 = por %p3356_p7, %p3355_p3 }
  0x44   : > { %p3358_p2 = pnand %p3357_p9, %p3351_p13 }
  0x46   : > { %3361 = shalt.err (!%p3358_p2)
}
  0x47   : > { %s3446_s20 = smov 128   ;;  %s3447_s26 = smov 8  }
  0x48   : > { %3070 = dma.hbm_to_vmem [thread:$0]  (!%p3572_p11), %s3570_s27, 32256, %s3576_s23, %s3578_s28, %s3446_s20, %s3446_s20, %s3447_s26  }
  0x49   : > { %p5097_p0 = scmp.ne.s32.totalorder %s5092_s17, 0 }
  0x4a   : > { %s3609_s22 = sand.u32 (!%p5097_p0), 1, %s3428_s10   ;;  %p5098_p5 = scmp.ne.s32.totalorder (!%p5097_p0), %s5090_s15, 0 }
  0x4b   : > { %146 = sbr.rel (%p5097_p0) target bundleno = 949 (0x3b5), region = 28  ;;  %s149_s30 = scalar_lea.sflag (!%p5097_p0), [#allocation4], %s3609_s22 }
  0x4c   : > { %s3052_s29 = smul.u32 (!%p5097_p0), 2016, %s3609_s22 }
  0x4e   : > { %s3613_s3 = scalar_lea.vmem (!%p5097_p0), [#allocation3], %s3052_s29 }
  0x52   : > { %3411 = dma.done.wait (%p5098_p5), %s149_s30, 32256  }
  0x53   : > { %3413 = vsyncadd (%p5098_p5), %s149_s30, 4294935040  ;;  %p5099_p11 = scmp.eq.s32.totalorder %s3491_s13, 0 }
  0x55   : > { %3415 = dma.done.wait (%p5099_p11), [#allocation7], 6144   ;;  %p5100_p1 = pmov %p5099_p11 }
  0x56   : > { %s3053_s17 = smul.u32 1120, %s3609_s22  ;;  %s3626_s19 = smov 0  }
  0x57   : > { %3417 = vsyncadd (%p5100_p1), [#allocation7], 4294961152 }
  0x58   : > { %s3624_s27 = scalar_lea.vmem [#allocation8], %s3053_s17 }
  0x59 LB: >> { %v3130_v0 = vld [vmem:[#allocation6 + $0x40] sm:$0xff]   ;;  %v3132_v2 = vld [vmem:[#allocation6 + $0x48] sm:$0xff]   ;;  %v3134_v4 = vld [vmem:[#allocation6 + $0x50] sm:$0xff]   ;;  %s2733_s15 = smul.u32 224, %s3440_s19  ;;  %s3448_s28 = smov 112   ;;  %s3440_s19 = sphi %s3626_s19, %s183_s19  }
  0x5a   : >> { %v3131_v1 = vld [vmem:[#allocation6] sm:$0xff]   ;;  %3034 = vmatprep.subr.bf16.mxu1 %v3130_v0  ;;  %2734 = vmatprep.subr.bf16.mxu0 %v3130_v0  ;;  %v3133_v3 = vld [vmem:[#allocation6 + $0x8] sm:$0xff]   ;;  %v3135_v5 = vld [vmem:[#allocation6 + $0x10] sm:$0xff]   ;;  %s3449_s4 = smov 96   ;;  %s3450_s5 = smov 80  }
  0x5b   : >> { %3042 = vmatpush3.bf16.msra.mxu1 %v3131_v1  ;;  %2735 = vmatpush3.bf16.msra.mxu0 %v3131_v1  ;;  %v3136_v6 = vld [vmem:[#allocation6 + $0x58] sm:$0xff]   ;;  %v3138_v8 = vld [vmem:[#allocation6 + $0x60] sm:$0xff]   ;;  %s3633_s23 = scalar_lea.vmem %s3613_s3, %s2733_s15 [#allocation3]  ;;  %v3140_v10 = vld [vmem:[#allocation6 + $0x68] sm:$0xff]   ;;  %s3451_s6 = smov 64  }
  0x5c   : >> { %3035 = vmatprep.subr.bf16.mxu1 %v3132_v2  ;;  %2736 = vmatprep.subr.bf16.mxu0 %v3132_v2  ;;  %v3137_v7 = vld [vmem:[#allocation6 + $0x18] sm:$0xff]   ;;  %v3139_v9 = vld [vmem:[#allocation6 + $0x20] sm:$0xff]   ;;  %v3141_v13 = vld [vmem:[#allocation6 + $0x28] sm:$0xff]   ;;  %s2400_s7 = smul.u32 160, %s3440_s19  ;;  %s183_s19 = sadd.s32 1, %s3440_s19  }
  0x5d   : >> { %v3148_v11 = vld [vmem:[%s3633_s23 + $0x74] ss:$8 sps:$4 sm:$0xff]   ;;  %v3151_v12 = vld [vmem:[%s3633_s23 + $0x4] ss:$8 sps:$4 sm:$0xff]   ;;  %v3146_v18 = vld [vmem:[%s3633_s23 + $0x70] ss:$8 sps:$4 sm:$0xff]  }
  0x5e   : >> { %v3142_v14 = vld [vmem:[#allocation6 + $0x70] sm:$0xff]   ;;  %571 = vmatprep.mubr.bf16.mxu1 %v3148_v11  ;;  %515 = vmatprep.mubr.bf16.mxu0 %v3151_v12  ;;  %v3144_v16 = vld [vmem:[#allocation6 + $0x78] sm:$0xff]   ;;  %v3149_v19 = vld [vmem:[%s3633_s23] ss:$8 sps:$4 sm:$0xff]   ;;  %s4862_s18 = scalar_lea.vmem %s3624_s27, %s2400_s7 [#allocation8]  ;;  %p180_p4 = scmp.ge.s32.totalorder %s183_s19, 7  }
  0x5f   : >> { %3043 = vmatpush3.bf16.msra.mxu1 %v3133_v3  ;;  %2737 = vmatpush3.bf16.msra.mxu0 %v3133_v3  ;;  %v3143_v15 = vld [vmem:[#allocation6 + $0x30] sm:$0xff]   ;;  %v3145_v17 = vld [vmem:[#allocation6 + $0x38] sm:$0xff]   ;;  %v3152_v20 = vld [vmem:[%s3633_s23 + $0x84] ss:$8 sps:$4 sm:$0xff]   ;;  %s3054_s24 = smul.u32 (%p180_p4), 17920, %s3491_s13  ;;  %s2436_s25 = sshll.u32 (%p180_p4), %s3624_s27, 4  ;;  %s5010_s25 = int_to_ptr.vmem [resolvable:$true] %s2436_s25 }
  0x60   : >> { %3036 = vmatprep.subr.bf16.mxu1 %v3134_v4  ;;  %2738 = vmatprep.subr.bf16.mxu0 %v3134_v4  ;;  %v3155_v21 = vld [vmem:[%s3633_s23 + $0x14] ss:$8 sps:$4 sm:$0xff]   ;;  %v3176_v22 = vld [vmem:[#allocation6 + $0xc0] sm:$0xff]   ;;  %v3180_v26 = vld [vmem:[#allocation6 + $0xc8] sm:$0xff]   ;;  %s2423_s30 = scalar_lea.sflag (%p180_p4), [#allocation5], %s3609_s22  ;;  %s3362_s17 = scalar_lea.vmem (%p180_p4), %s5010_s25, 17920 }
  0x61   : >> { %v3177_v23 = vld [vmem:[#allocation6 + $0x80] sm:$0xff]   ;;  %v3157_v28 = vld [vmem:[%s3633_s23 + $0x10] ss:$8 sps:$4 sm:$0xff]   ;;  %v3181_v29 = vld [vmem:[#allocation6 + $0x88] sm:$0xff]   ;;  %s5008_s29 = scalar_lea.hbm (%p180_p4), %s5056_s2, %s3054_s24  ;;  %p3363_p6 = scmp.ne.s32.totalorder (%p180_p4), %s5010_s25, %s3362_s17 }
  0x62   : >> { %v3178_v24 = vld [vmem:[#allocation6 + $0x140] sm:$0xff]   ;;  %v3161_v31 = vld [vmem:[%s3633_s23 + $0x94] ss:$8 sps:$4 sm:$0xff]   ;;  %v3184_v32 = vld [vmem:[#allocation6 + $0x148] sm:$0xff]   ;;  %s3452_s3 = smov (%p180_p4), [#allocation8]  }
  0x63   : >> { %3044 = vmatpush3.bf16.msra.mxu1 %v3135_v5  ;;  %2739 = vmatpush3.bf16.msra.mxu0 %v3135_v5  ;;  %v3179_v25 = vld [vmem:[#allocation6 + $0x100] sm:$0xff]   ;;  %v3186_v33 = vld [vmem:[#allocation6 + $0x108] sm:$0xff]   ;;  %v3187_v34 = vld [vmem:[#allocation6 + $0xd0] sm:$0xff]   ;;  %p3364_p8 = pnand (%p180_p4), %p3363_p6, %p3561_p12  ;;  %s3366_s19 = sshll.u32 (%p180_p4), %s3452_s3, 4  ;;  %s3367_s19 = int_to_ptr.vmem [resolvable:$false] %s3366_s19 }
  0x64   : >> { %3037 = vmatprep.subr.bf16.mxu1 %v3136_v6  ;;  %2740 = vmatprep.subr.bf16.mxu0 %v3136_v6  ;;  %v3154_v27 = vld [vmem:[%s3633_s23 + $0x80] ss:$8 sps:$4 sm:$0xff]   ;;  %v3158_v30 = vld [vmem:[%s3633_s23 + $0x24] ss:$8 sps:$4 sm:$0xff]   ;;  %v3188_v35 = vld [vmem:[#allocation6 + $0x90] sm:$0xff]   ;;  %s3368_s13 = scalar_lea.vmem (%p180_p4), %s3367_s19, 35840  ;;  %p3369_p13 = scmp.lt.s32.totalorder (%p180_p4), %s5010_s25, %s3367_s19 }
  0x65   : >> { %v3189_v36 = vld [vmem:[#allocation6 + $0x150] sm:$0xff]   ;;  %v3160_v38 = vld [vmem:[%s3633_s23 + $0x20] ss:$8 sps:$4 sm:$0xff]   ;;  %v3194_v40 = vld [vmem:[#allocation6 + $0xd8] sm:$0xff]   ;;  %p3365_p10 = pneg (%p180_p4), %p3364_p8  ;;  %p3370_p3 = scmp.lt.s32.totalorder (%p180_p4), %s3368_s13, %s3362_s17 }
  0x66   : >> { %v3192_v37 = vld [vmem:[#allocation6 + $0x110] sm:$0xff]   ;;  %v3167_v42 = vld [vmem:[%s3633_s23 + $0xa4] ss:$8 sps:$4 sm:$0xff]   ;;  %v3195_v43 = vld [vmem:[#allocation6 + $0x98] sm:$0xff]  }
  0x67   : >> { %3045 = vmatpush3.bf16.msra.mxu1 %v3137_v7  ;;  %2741 = vmatpush3.bf16.msra.mxu0 %v3137_v7  ;;  %v3163_v39 = vld [vmem:[%s3633_s23 + $0x90] ss:$8 sps:$4 sm:$0xff]   ;;  %v3164_v41 = vld [vmem:[%s3633_s23 + $0x34] ss:$8 sps:$4 sm:$0xff]   ;;  %v3198_v46 = vld [vmem:[#allocation6 + $0xe0] sm:$0xff]   ;;  %p3371_p7 = por (%p180_p4), %p3370_p3, %p3369_p13 }
  0x68   : >> { %3038 = vmatprep.subr.bf16.mxu1 %v3138_v8  ;;  %2742 = vmatprep.subr.bf16.mxu0 %v3138_v8  ;;  %v3196_v44 = vld [vmem:[#allocation6 + $0x158] sm:$0xff]   ;;  %v3201_v47 = vld [vmem:[#allocation6 + $0xa0] sm:$0xff]   ;;  %v3205_v54 = vld [vmem:[#allocation6 + $0xe8] sm:$0xff]  }
  0x69   : >> { %v3197_v45 = vld [vmem:[#allocation6 + $0x118] sm:$0xff]   ;;  %v3169_v49 = vld [vmem:[%s3633_s23 + $0xa0] ss:$8 sps:$4 sm:$0xff]   ;;  %v3170_v51 = vld [vmem:[%s3633_s23 + $0x44] ss:$8 sps:$4 sm:$0xff]   ;;  %p3372_p9 = pnand (%p180_p4), %p3371_p7, %p3365_p10 }
  0x6a   : >> { %v3166_v48 = vld [vmem:[%s3633_s23 + $0x30] ss:$8 sps:$4 sm:$0xff]   ;;  %v3203_v50 = vld [vmem:[#allocation6 + $0x160] sm:$0xff]   ;;  %v3173_v52 = vld [vmem:[%s3633_s23 + $0xb4] ss:$8 sps:$4 sm:$0xff]  }
  0x6b   : >> { %3046 = vmatpush3.bf16.msra.mxu1 %v3139_v9  ;;  %2743 = vmatpush3.bf16.msra.mxu0 %v3139_v9  ;;  %v3204_v53 = vld [vmem:[#allocation6 + $0x120] sm:$0xff]   ;;  %v3206_v55 = vld [vmem:[#allocation6 + $0xa8] sm:$0xff]   ;;  %v3209_v58 = vld [vmem:[#allocation6 + $0xf0] sm:$0xff]  }
  0x6c   : >> { %3039 = vmatprep.subr.bf16.mxu1 %v3140_v10  ;;  %2744 = vmatprep.subr.bf16.mxu0 %v3140_v10  ;;  %v3207_v56 = vld [vmem:[#allocation6 + $0x168] sm:$0xff]   ;;  %v3210_v59 = vld [vmem:[#allocation6 + $0xb0] sm:$0xff]   ;;  %v3216_v2 = vld [vmem:[#allocation6 + $0xf8] sm:$0xff]  }
  0x6d   : >> { %v3208_v57 = vld [vmem:[#allocation6 + $0x128] sm:$0xff]   ;;  %v3175_v61 = vld [vmem:[%s3633_s23 + $0xb0] ss:$8 sps:$4 sm:$0xff]   ;;  %v3182_v62 = vld [vmem:[%s3633_s23 + $0x54] ss:$8 sps:$4 sm:$0xff]  }
  0x6e   : >> { %v3172_v60 = vld [vmem:[%s3633_s23 + $0x40] ss:$8 sps:$4 sm:$0xff]   ;;  %v3199_v63 = vld [vmem:[%s3633_s23 + $0xc4] ss:$8 sps:$4 sm:$0xff]   ;;  %v3214_v0 = vld [vmem:[#allocation6 + $0x170] sm:$0xff]  }
  0x6f   : >> { %3047 = vmatpush3.bf16.msra.mxu1 %v3141_v13  ;;  %2745 = vmatpush3.bf16.msra.mxu0 %v3141_v13  ;;  %v3215_v1 = vld [vmem:[#allocation6 + $0x130] sm:$0xff]   ;;  %v3217_v3 = vld [vmem:[#allocation6 + $0xb8] sm:$0xff]   ;;  %v3202_v7 = vld [vmem:[%s3633_s23 + $0xc0] ss:$8 sps:$4 sm:$0xff]  }
  0x70   : >> { %3040 = vmatprep.subr.bf16.mxu1 %v3142_v14  ;;  %2746 = vmatprep.subr.bf16.mxu0 %v3142_v14  ;;  %v3221_v4 = vld [vmem:[#allocation6 + $0x178] sm:$0xff]   ;;  %v3190_v8 = vld [vmem:[%s3633_s23 + $0x64] ss:$8 sps:$4 sm:$0xff]   ;;  %v3193_v10 = vld [vmem:[%s3633_s23 + $0x60] ss:$8 sps:$4 sm:$0xff]  }
  0x71   : >> { %v3222_v5 = vld [vmem:[#allocation6 + $0x138] sm:$0xff]   ;;  %v3220_v12 = vld [vmem:[%s3633_s23 + $0xe4] ss:$8 sps:$4 sm:$0xff]   ;;  %v3218_v14 = vld [vmem:[%s3633_s23 + $0xe0] ss:$8 sps:$4 sm:$0xff]  }
  0x72   : >> { %v3185_v6 = vld [vmem:[%s3633_s23 + $0x50] ss:$8 sps:$4 sm:$0xff]   ;;  %v3211_v9 = vld [vmem:[%s3633_s23 + $0xd4] ss:$8 sps:$4 sm:$0xff]   ;;  %v3225_v13 = vld [vmem:[%s3633_s23 + $0x1c4] ss:$8 sps:$4 sm:$0xff]  }
  0x73   : >> { %3048 = vmatpush3.bf16.msra.mxu1 %v3143_v15  ;;  %2747 = vmatpush3.bf16.msra.mxu0 %v3143_v15  ;;  %v3213_v11 = vld [vmem:[%s3633_s23 + $0xd0] ss:$8 sps:$4 sm:$0xff]   ;;  %v3223_v15 = vld [vmem:[%s3633_s23 + $0x1c0] ss:$8 sps:$4 sm:$0xff]  }
  0x74   : >> { %3041 = vmatprep.subr.bf16.mxu1 %v3144_v16  ;;  %2748 = vmatprep.subr.bf16.mxu0 %v3144_v16  ;;  %v3226_v16 = vld [vmem:[%s3633_s23 + $0xf4] ss:$8 sps:$4 sm:$0xff]  }
  0x77   : >> { %3049 = vmatpush3.bf16.msra.mxu1 %v3145_v17  ;;  %2749 = vmatpush3.bf16.msra.mxu0 %v3145_v17  ;;  %v3229_v17 = vld [vmem:[%s3633_s23 + $0x1d4] ss:$8 sps:$4 sm:$0xff]  }
  0x78   : >> { %2834 = vmatprep.subr.bf16.mxu1 %v3176_v22  ;;  %2934 = vmatprep.subr.bf16.mxu0 %v3178_v24  ;;  %v3234_v22 = vld [vmem:[%s3633_s23 + $0x100] ss:$8 sps:$4 sm:$0xff]   ;;  %v3238_v24 = vld [vmem:[%s3633_s23 + $0x114] ss:$8 sps:$4 sm:$0xff]  }
  0x7a   : >> { %572 = vmatmul.mubr.bf16.vlgmr.msra.gmra.mrb[0].mxu1 %v3146_v18  ;;  %516 = vmatmul.mubr.bf16.vlgmr.msra.gmra.mrb[0].mxu0 %v3149_v19  ;;  %v3228_v18 = vld [vmem:[%s3633_s23 + $0xf0] ss:$8 sps:$4 sm:$0xff]  }
  0x7b   : >> { %579 = vmatprep.mubr.bf16.mxu1 %v3152_v20  ;;  %523 = vmatprep.mubr.bf16.mxu0 %v3155_v21  ;;  %v3231_v19 = vld [vmem:[%s3633_s23 + $0x1d0] ss:$8 sps:$4 sm:$0xff]   ;;  %v3232_v20 = vld [vmem:[%s3633_s23 + $0x104] ss:$8 sps:$4 sm:$0xff]  }
  0x7c   : >> { %2835 = vmatpush3.bf16.msra.mxu1 %v3177_v23  ;;  %2935 = vmatpush3.bf16.msra.mxu0 %v3179_v25  ;;  %v3235_v21 = vld [vmem:[%s3633_s23 + $0x1e4] ss:$8 sps:$4 sm:$0xff]   ;;  %v3237_v23 = vld [vmem:[%s3633_s23 + $0x1e0] ss:$8 sps:$4 sm:$0xff]   ;;  %v3241_v25 = vld [vmem:[%s3633_s23 + $0x1f4] ss:$8 sps:$4 sm:$0xff]  }
  0x7d   : >> { %2836 = vmatprep.subr.bf16.mxu1 %v3180_v26  ;;  %2936 = vmatprep.subr.bf16.mxu0 %v3184_v32  ;;  %v3240_v26 = vld [vmem:[%s3633_s23 + $0x110] ss:$8 sps:$4 sm:$0xff]   ;;  %v3250_v32 = vld [vmem:[%s3633_s23 + $0x134] ss:$8 sps:$4 sm:$0xff]  }
  0x80   : >> { %2837 = vmatpush3.bf16.msra.mxu1 %v3181_v29  ;;  %2937 = vmatpush3.bf16.msra.mxu0 %v3186_v33  ;;  %v3246_v29 = vld [vmem:[%s3633_s23 + $0x120] ss:$8 sps:$4 sm:$0xff]   ;;  %v3252_v33 = vld [vmem:[%s3633_s23 + $0x130] ss:$8 sps:$4 sm:$0xff]  }
  0x81   : >> { %2838 = vmatprep.subr.bf16.mxu1 %v3187_v34  ;;  %2938 = vmatprep.subr.bf16.mxu0 %v3189_v36  ;;  %v3253_v34 = vld [vmem:[%s3633_s23 + $0x214] ss:$8 sps:$4 sm:$0xff]   ;;  %v3256_v36 = vld [vmem:[%s3633_s23 + $0x144] ss:$8 sps:$4 sm:$0xff]  }
  0x82   : >> { %580 = vmatmul.mubr.bf16.gmra.mrb[4].mxu1 %v3154_v27  ;;  %524 = vmatmul.mubr.bf16.gmra.mrb[4].mxu0 %v3157_v28  ;;  %v3243_v27 = vld [vmem:[%s3633_s23 + $0x1f0] ss:$8 sps:$4 sm:$0xff]   ;;  %v3244_v28 = vld [vmem:[%s3633_s23 + $0x124] ss:$8 sps:$4 sm:$0xff]  }
  0x83   : >> { %531 = vmatprep.mubr.bf16.mxu0 %v3158_v30  ;;  %587 = vmatprep.mubr.bf16.mxu1 %v3161_v31  ;;  %v3247_v30 = vld [vmem:[%s3633_s23 + $0x204] ss:$8 sps:$4 sm:$0xff]   ;;  %v3249_v31 = vld [vmem:[%s3633_s23 + $0x200] ss:$8 sps:$4 sm:$0xff]  }
  0x84   : >> { %2839 = vmatpush3.bf16.msra.mxu1 %v3188_v35  ;;  %2939 = vmatpush3.bf16.msra.mxu0 %v3192_v37  ;;  %v3255_v35 = vld [vmem:[%s3633_s23 + $0x210] ss:$8 sps:$4 sm:$0xff]   ;;  %v3258_v37 = vld [vmem:[%s3633_s23 + $0x140] ss:$8 sps:$4 sm:$0xff]  }
  0x85   : >> { %2840 = vmatprep.subr.bf16.mxu1 %v3194_v40  ;;  %2940 = vmatprep.subr.bf16.mxu0 %v3196_v44  ;;  %v3262_v40 = vld [vmem:[%s3633_s23 + $0x154] ss:$8 sps:$4 sm:$0xff]   ;;  %v3268_v44 = vld [vmem:[%s3633_s23 + $0x164] ss:$8 sps:$4 sm:$0xff]  }
  0x88   : >> { %2841 = vmatpush3.bf16.msra.mxu1 %v3195_v43  ;;  %2941 = vmatpush3.bf16.msra.mxu0 %v3197_v45  ;;  %v3267_v43 = vld [vmem:[%s3633_s23 + $0x230] ss:$8 sps:$4 sm:$0xff]   ;;  %v3270_v45 = vld [vmem:[%s3633_s23 + $0x160] ss:$8 sps:$4 sm:$0xff]  }
  0x89   : >> { %2842 = vmatprep.subr.bf16.mxu1 %v3198_v46  ;;  %2942 = vmatprep.subr.bf16.mxu0 %v3203_v50  ;;  %v3271_v46 = vld [vmem:[%s3633_s23 + $0x244] ss:$8 sps:$4 sm:$0xff]  }
  0x8a   : >> { %532 = vmatmul.mubr.bf16.gmra.mrb[8].mxu0 %v3160_v38  ;;  %588 = vmatmul.mubr.bf16.gmra.mrb[8].mxu1 %v3163_v39  ;;  %v3259_v38 = vld [vmem:[%s3633_s23 + $0x224] ss:$8 sps:$4 sm:$0xff]   ;;  %v3261_v39 = vld [vmem:[%s3633_s23 + $0x220] ss:$8 sps:$4 sm:$0xff]  }
  0x8b   : >> { %539 = vmatprep.mubr.bf16.mxu0 %v3164_v41  ;;  %595 = vmatprep.mubr.bf16.mxu1 %v3167_v42  ;;  %v3264_v41 = vld [vmem:[%s3633_s23 + $0x150] ss:$8 sps:$4 sm:$0xff]   ;;  %v3265_v42 = vld [vmem:[%s3633_s23 + $0x234] ss:$8 sps:$4 sm:$0xff]  }
  0x8c   : >> { %2843 = vmatpush3.bf16.msra.mxu1 %v3201_v47  ;;  %2943 = vmatpush3.bf16.msra.mxu0 %v3204_v53  ;;  %v3273_v47 = vld [vmem:[%s3633_s23 + $0x240] ss:$8 sps:$4 sm:$0xff]  }
  0x8d   : >> { %2844 = vmatprep.subr.bf16.mxu1 %v3205_v54  ;;  %2944 = vmatprep.subr.bf16.mxu0 %v3207_v56 }
  0x90   : >> { %2845 = vmatpush3.bf16.msra.mxu1 %v3206_v55  ;;  %2945 = vmatpush3.bf16.msra.mxu0 %v3208_v57 }
  0x91   : >> { %2846 = vmatprep.subr.bf16.mxu1 %v3209_v58  ;;  %2946 = vmatprep.subr.bf16.mxu0 %v3214_v0 }
  0x92   : >> { %540 = vmatmul.mubr.bf16.gmra.mrb[12].mxu0 %v3166_v48  ;;  %596 = vmatmul.mubr.bf16.gmra.mrb[12].mxu1 %v3169_v49  ;;  %v3274_v48 = vld [vmem:[%s3633_s23 + $0x174] ss:$8 sps:$4 sm:$0xff]   ;;  %v3276_v49 = vld [vmem:[%s3633_s23 + $0x170] ss:$8 sps:$4 sm:$0xff]  }
  0x93   : >> { %547 = vmatprep.mubr.bf16.mxu0 %v3170_v51  ;;  %603 = vmatprep.mubr.bf16.mxu1 %v3173_v52 }
  0x94   : >> { %2847 = vmatpush3.bf16.msra.mxu1 %v3210_v59  ;;  %2947 = vmatpush3.bf16.msra.mxu0 %v3215_v1 }
  0x95   : >> { %2848 = vmatprep.subr.bf16.mxu1 %v3216_v2  ;;  %2948 = vmatprep.subr.bf16.mxu0 %v3221_v4 }
  0x98   : >> { %2849 = vmatpush3.bf16.msra.mxu1 %v3217_v3  ;;  %2949 = vmatpush3.bf16.msra.mxu0 %v3222_v5 }
  0x9a   : >> { %548 = vmatmul.mubr.bf16.gmra.mrb[16].mxu0 %v3172_v60  ;;  %604 = vmatmul.mubr.bf16.gmra.mrb[16].mxu1 %v3175_v61  ;;  %v3277_v60 = vld [vmem:[%s3633_s23 + $0x254] ss:$8 sps:$4 sm:$0xff]  }
  0x9b   : >> { %555 = vmatprep.mubr.bf16.mxu0 %v3182_v62  ;;  %611 = vmatprep.mubr.bf16.mxu1 %v3199_v63  ;;  %v3279_v63 = vld [vmem:[%s3633_s23 + $0x250] ss:$8 sps:$4 sm:$0xff]  }
  0xa2   : >> { %556 = vmatmul.mubr.bf16.gmra.mrb[20].mxu0 %v3185_v6  ;;  %612 = vmatmul.mubr.bf16.gmra.mrb[20].mxu1 %v3202_v7 }
  0xa3   : >> { %563 = vmatprep.mubr.bf16.mxu0 %v3190_v8  ;;  %619 = vmatprep.mubr.bf16.mxu1 %v3211_v9 }
  0xaa   : >> { %564 = vmatmul.mubr.bf16.gmra.mrb[24].mxu0 %v3193_v10  ;;  %620 = vmatmul.mubr.bf16.gmra.mrb[24].mxu1 %v3213_v11  ;;  %v3280_v10 = vld [vmem:[%s3633_s23 + $0x184] ss:$8 sps:$4 sm:$0xff]  }
  0xab   : >> { %1221 = vmatprep.mubr.bf16.mxu1 %v3220_v12  ;;  %1967 = vmatprep.mubr.bf16.mxu0 %v3225_v13  ;;  %v3282_v13 = vld [vmem:[%s3633_s23 + $0x180] ss:$8 sps:$4 sm:$0xff]  }
  0xb2   : >> { %1222 = vmatmul.mubr.bf16.vlgmr.msra.gmra.mrb[28].mxu1 %v3218_v14  ;;  %1968 = vmatmul.mubr.bf16.vlgmr.msra.gmra.mrb[28].mxu0 %v3223_v15 }
  0xb3   : >> { %1229 = vmatprep.mubr.bf16.mxu1 %v3226_v16  ;;  %1975 = vmatprep.mubr.bf16.mxu0 %v3229_v17 }
  0xba   : >> { %1230 = vmatmul.mubr.bf16.gmra.mrb[32].mxu1 %v3228_v18  ;;  %1976 = vmatmul.mubr.bf16.gmra.mrb[32].mxu0 %v3231_v19 }
  0xbb   : >> { %1237 = vmatprep.mubr.bf16.mxu1 %v3232_v20  ;;  %1983 = vmatprep.mubr.bf16.mxu0 %v3235_v21 }
  0xc2   : >> { %1238 = vmatmul.mubr.bf16.gmra.mrb[36].mxu1 %v3234_v22  ;;  %1984 = vmatmul.mubr.bf16.gmra.mrb[36].mxu0 %v3237_v23 }
  0xc3   : >> { %1245 = vmatprep.mubr.bf16.mxu1 %v3238_v24  ;;  %1991 = vmatprep.mubr.bf16.mxu0 %v3241_v25 }
  0xca   : >> { %1246 = vmatmul.mubr.bf16.gmra.mrb[40].mxu1 %v3240_v26  ;;  %1992 = vmatmul.mubr.bf16.gmra.mrb[40].mxu0 %v3243_v27 }
  0xcb   : >> { %1253 = vmatprep.mubr.bf16.mxu1 %v3244_v28  ;;  %1999 = vmatprep.mubr.bf16.mxu0 %v3247_v30 }
  0xd2   : >> { %1254 = vmatmul.mubr.bf16.gmra.mrb[44].mxu1 %v3246_v29  ;;  %2000 = vmatmul.mubr.bf16.gmra.mrb[44].mxu0 %v3249_v31 }
  0xd3   : >> { %1261 = vmatprep.mubr.bf16.mxu1 %v3250_v32  ;;  %2007 = vmatprep.mubr.bf16.mxu0 %v3253_v34 }
  0xda   : >> { %1262 = vmatmul.mubr.bf16.gmra.mrb[48].mxu1 %v3252_v33  ;;  %2008 = vmatmul.mubr.bf16.gmra.mrb[48].mxu0 %v3255_v35 }
  0xdb   : >> { %1269 = vmatprep.mubr.bf16.mxu1 %v3256_v36  ;;  %2015 = vmatprep.mubr.bf16.mxu0 %v3259_v38  ;;  %v3283_v36 = vld [vmem:[%s3633_s23 + $0x264] ss:$8 sps:$4 sm:$0xff]  }
  0xe2   : >> { %1270 = vmatmul.mubr.bf16.gmra.mrb[52].mxu1 %v3258_v37  ;;  %2016 = vmatmul.mubr.bf16.gmra.mrb[52].mxu0 %v3261_v39  ;;  %v3285_v39 = vld [vmem:[%s3633_s23 + $0x260] ss:$8 sps:$4 sm:$0xff]  }
  0xe3   : >> { %1277 = vmatprep.mubr.bf16.mxu1 %v3262_v40  ;;  %2023 = vmatprep.mubr.bf16.mxu0 %v3265_v42 }
  0xea   : >> { %1278 = vmatmul.mubr.bf16.gmra.mrb[56].mxu1 %v3264_v41  ;;  %2024 = vmatmul.mubr.bf16.gmra.mrb[56].mxu0 %v3267_v43 }
  0xeb   : >> { %1285 = vmatprep.mubr.bf16.mxu1 %v3268_v44  ;;  %2031 = vmatprep.mubr.bf16.mxu0 %v3271_v46 }
  0xf2   : >> { %1286 = vmatmul.mubr.bf16.gmra.mrb[60].mxu1 %v3270_v45  ;;  %2032 = vmatmul.mubr.bf16.gmra.mrb[60].mxu0 %v3273_v47 }
  0xf3   : >> { %1293 = vmatprep.mubr.bf16.mxu1 %v3274_v48  ;;  %2039 = vmatprep.mubr.bf16.mxu0 %v3277_v60 }
  0xfa   : >> { %1294 = vmatmul.mubr.bf16.gmra.mrb[64].mxu1 %v3276_v49  ;;  %2040 = vmatmul.mubr.bf16.gmra.mrb[64].mxu0 %v3279_v63 }
  0xfb   : >> { %1301 = vmatprep.mubr.bf16.mxu1 %v3280_v10  ;;  %2047 = vmatprep.mubr.bf16.mxu0 %v3283_v36 }
 0x102   : >> { %1302 = vmatmul.mubr.bf16.gmra.mrb[68].mxu1 %v3282_v13  ;;  %2048 = vmatmul.mubr.bf16.gmra.mrb[68].mxu0 %v3285_v39  ;;  %v3291_v13 = vld [vmem:[%s3633_s23 + $0x270] ss:$8 sps:$4 sm:$0xff]  }
 0x14d   : >> { %v2792_v50 = vpop.f32.mrb[0].mxu1  ;;  %v2750_v51 = vpop.f32.mrb[0].mxu0 }
 0x14e   : >> { %v2793_v52 = vpop.f32.mrb[1].mxu1  ;;  %v2751_v53 = vpop.f32.mrb[1].mxu0 }
 0x14f   : >> { %v3701_v54 = vadd.f32 %v2793_v52, %v2792_v50  ;;  %v2795_v55 = vpop.f32.mrb[2].mxu1  ;;  %v3703_v56 = vadd.f32 %v2751_v53, %v2750_v51  ;;  %v2753_v57 = vpop.f32.mrb[2].mxu0  ;;  %v3286_v50 = vld [vmem:[%s3633_s23 + $0x194] ss:$8 sps:$4 sm:$0xff]   ;;  %v3288_v53 = vld [vmem:[%s3633_s23 + $0x190] ss:$8 sps:$4 sm:$0xff]  }
 0x150   : >> { %v2796_v58 = vpop.f32.mrb[3].mxu1  ;;  %v2754_v59 = vpop.f32.mrb[3].mxu0  ;;  %1309 = vmatprep.mubr.bf16.mxu1 %v3286_v50 }
 0x151   : >> { %5101 = vst [vmem:[#allocation12_spill] sm:$0xff] %v3701_v54  ;;  %v3706_v61 = vadd.f32 %v2796_v58, %v2795_v55  ;;  %652 = vrot.lane.b32.xlu0 %v3701_v54, %s3448_s28  ;;  %v3710_v62 = vadd.f32 %v2754_v59, %v2753_v57  ;;  %1310 = vmatmul.mubr.bf16.gmra.mrb[72].mxu1 %v3288_v53 }
 0x153   : >> { %5102 = vst [vmem:[#allocation13_spill] sm:$0xff] %v3706_v61  ;;  %654 = vrot.lane.b32.xlu1 %v3706_v61, %s3448_s28 }
 0x155   : >> { %708 = vrot.lane.b32.xlu0 %v3701_v54, %s3449_s4  ;;  %v2798_v0 = vpop.f32.mrb[4].mxu1  ;;  %v2756_v1 = vpop.f32.mrb[4].mxu0 }
 0x156   : >> { %v2799_v2 = vpop.f32.mrb[5].mxu1  ;;  %v2757_v3 = vpop.f32.mrb[5].mxu0 }
 0x157   : >> { %710 = vrot.lane.b32.xlu1 %v3706_v61, %s3449_s4  ;;  %v3719_v4 = vadd.f32 %v2799_v2, %v2798_v0  ;;  %v2801_v5 = vpop.f32.mrb[6].mxu1  ;;  %v3721_v6 = vadd.f32 %v2757_v3, %v2756_v1  ;;  %v2759_v7 = vpop.f32.mrb[6].mxu0 }
 0x158   : >> { %v2802_v8 = vpop.f32.mrb[7].mxu1  ;;  %v2760_v9 = vpop.f32.mrb[7].mxu0 }
 0x159   : >> { %5103 = vst [vmem:[#allocation14_spill] sm:$0xff] %v3719_v4  ;;  %5104 = vst [vmem:[#allocation15_spill] sm:$0xff] %v3721_v6  ;;  %764 = vrot.lane.b32.xlu0 %v3701_v54, %s3450_s5  ;;  %v3726_v11 = vadd.f32 %v2802_v8, %v2801_v5  ;;  %v3728_v12 = vadd.f32 %v2760_v9, %v2759_v7  ;;  %v3289_v8 = vld [vmem:[%s3633_s23 + $0x274] ss:$8 sps:$4 sm:$0xff]  }
 0x15a   : >> { %2055 = vmatprep.mubr.bf16.mxu0 %v3289_v8 }
 0x15b   : >> { %5105 = vst [vmem:[#allocation16_spill] sm:$0xff] %v3726_v11  ;;  %5106 = vst [vmem:[#allocation17_spill] sm:$0xff] %v3728_v12  ;;  %766 = vrot.lane.b32.xlu1 %v3706_v61, %s3450_s5  ;;  %2056 = vmatmul.mubr.bf16.gmra.mrb[72].mxu0 %v3291_v13 }
 0x15d   : >> { %820 = vrot.lane.b32.xlu0 %v3701_v54, %s3451_s6  ;;  %v2762_v14 = vpop.f32.mrb[8].mxu0  ;;  %v2804_v15 = vpop.f32.mrb[8].mxu1 }
 0x15e   : >> { %v2763_v16 = vpop.f32.mrb[9].mxu0  ;;  %v2805_v17 = vpop.f32.mrb[9].mxu1 }
 0x15f   : >> { %822 = vrot.lane.b32.xlu1 %v3706_v61, %s3451_s6  ;;  %v3737_v18 = vadd.f32 %v2763_v16, %v2762_v14  ;;  %v2765_v19 = vpop.f32.mrb[10].mxu0  ;;  %v3739_v20 = vadd.f32 %v2805_v17, %v2804_v15  ;;  %v2807_v21 = vpop.f32.mrb[10].mxu1 }
 0x160   : >> { %v2766_v22 = vpop.f32.mrb[11].mxu0  ;;  %v2808_v23 = vpop.f32.mrb[11].mxu1 }
 0x161   : >> { %5107 = vst [vmem:[#allocation18_spill] sm:$0xff] %v3737_v18  ;;  %5108 = vst [vmem:[#allocation19_spill] sm:$0xff] %v3739_v20  ;;  %628 = vrot.lane.b32.xlu0 %v3721_v6, %s3448_s28  ;;  %v3743_v24 = vadd.f32 %v2766_v22, %v2765_v19  ;;  %v3745_v25 = vadd.f32 %v2808_v23, %v2807_v21 }
 0x163   : >> { %5109 = vst [vmem:[#allocation20_spill] sm:$0xff] %v3743_v24  ;;  %5110 = vst [vmem:[#allocation21_spill] sm:$0xff] %v3745_v25  ;;  %658 = vrot.lane.b32.xlu1 %v3726_v11, %s3448_s28 }
 0x165   : >> { %656 = vrot.lane.b32.xlu0 %v3719_v4, %s3448_s28  ;;  %v2768_v26 = vpop.f32.mrb[12].mxu0  ;;  %v2810_v27 = vpop.f32.mrb[12].mxu1 }
 0x166   : >> { %v2769_v28 = vpop.f32.mrb[13].mxu0  ;;  %v2811_v29 = vpop.f32.mrb[13].mxu1 }
 0x167   : >> { %714 = vrot.lane.b32.xlu1 %v3726_v11, %s3449_s4  ;;  %v3753_v30 = vadd.f32 %v2769_v28, %v2768_v26  ;;  %v2771_v31 = vpop.f32.mrb[14].mxu0  ;;  %v3755_v32 = vadd.f32 %v2811_v29, %v2810_v27  ;;  %v2813_v33 = vpop.f32.mrb[14].mxu1  ;;  %v3292_v28 = vld [vmem:[%s3633_s23 + $0x1a4] ss:$8 sps:$4 sm:$0xff]   ;;  %v3294_v29 = vld [vmem:[%s3633_s23 + $0x1a0] ss:$8 sps:$4 sm:$0xff]  }
 0x168   : >> { %v2772_v34 = vpop.f32.mrb[15].mxu0  ;;  %v2814_v35 = vpop.f32.mrb[15].mxu1  ;;  %1317 = vmatprep.mubr.bf16.mxu1 %v3292_v28 }
 0x169   : >> { %5111 = vst [vmem:[#allocation22_spill] sm:$0xff] %v3753_v30  ;;  %712 = vrot.lane.b32.xlu0 %v3719_v4, %s3449_s4  ;;  %v3760_v37 = vadd.f32 %v2772_v34, %v2771_v31  ;;  %v3762_v38 = vadd.f32 %v2814_v35, %v2813_v33  ;;  %1318 = vmatmul.mubr.bf16.gmra.mrb[76].mxu1 %v3294_v29 }
 0x16b   : >> { %5112 = vst [vmem:[#allocation23_spill] sm:$0xff] %v3760_v37  ;;  %770 = vrot.lane.b32.xlu1 %v3726_v11, %s3450_s5 }
 0x16d   : >> { %768 = vrot.lane.b32.xlu0 %v3719_v4, %s3450_s5  ;;  %v2774_v40 = vpop.f32.mrb[16].mxu0  ;;  %v2816_v41 = vpop.f32.mrb[16].mxu1 }
 0x16e   : >> { %v2775_v42 = vpop.f32.mrb[17].mxu0  ;;  %v2817_v43 = vpop.f32.mrb[17].mxu1 }
 0x16f   : >> { %826 = vrot.lane.b32.xlu1 %v3726_v11, %s3451_s6  ;;  %v3771_v44 = vadd.f32 %v2775_v42, %v2774_v40  ;;  %v2777_v45 = vpop.f32.mrb[18].mxu0  ;;  %v3773_v46 = vadd.f32 %v2817_v43, %v2816_v41  ;;  %v2819_v47 = vpop.f32.mrb[18].mxu1 }
 0x170   : >> { %v2778_v48 = vpop.f32.mrb[19].mxu0  ;;  %v2820_v49 = vpop.f32.mrb[19].mxu1 }
 0x171   : >> { %5113 = vst [vmem:[#allocation24_spill] sm:$0xff] %v3771_v44  ;;  %824 = vrot.lane.b32.xlu0 %v3719_v4, %s3451_s6  ;;  %v3778_v51 = vadd.f32 %v2778_v48, %v2777_v45  ;;  %v3780_v52 = vadd.f32 %v2820_v49, %v2819_v47 }
 0x173   : >> { %5114 = vst [vmem:[#allocation25_spill] sm:$0xff] %v3778_v51  ;;  %632 = vrot.lane.b32.xlu1 %v3737_v18, %s3448_s28 }
 0x175   : >> { %630 = vrot.lane.b32.xlu0 %v3728_v12, %s3448_s28  ;;  %v2780_v55 = vpop.f32.mrb[20].mxu0  ;;  %v2822_v57 = vpop.f32.mrb[20].mxu1 }
 0x176   : >> { %v2781_v58 = vpop.f32.mrb[21].mxu0  ;;  %v2823_v59 = vpop.f32.mrb[21].mxu1 }
 0x177   : >> { %634 = vrot.lane.b32.xlu1 %v3743_v24, %s3448_s28  ;;  %v3789_v60 = vadd.f32 %v2781_v58, %v2780_v55  ;;  %v2783_v63 = vpop.f32.mrb[22].mxu0  ;;  %v3791_v0 = vadd.f32 %v2823_v59, %v2822_v57  ;;  %v2825_v1 = vpop.f32.mrb[22].mxu1  ;;  %v3295_v55 = vld [vmem:[%s3633_s23 + $0x1b4] ss:$8 sps:$4 sm:$0xff]  }
 0x178   : >> { %v2784_v2 = vpop.f32.mrb[23].mxu0  ;;  %v2826_v3 = vpop.f32.mrb[23].mxu1  ;;  %1325 = vmatprep.mubr.bf16.mxu1 %v3295_v55 }
 0x179   : >> { %5115 = vst [vmem:[#allocation26_spill] sm:$0xff] %v3789_v60  ;;  %660 = vrot.lane.b32.xlu0 %v3739_v20, %s3448_s28  ;;  %v3795_v5 = vadd.f32 %v2784_v2, %v2783_v63  ;;  %v3797_v7 = vadd.f32 %v2826_v3, %v2825_v1  ;;  %v3297_v1 = vld [vmem:[%s3633_s23 + $0x1b0] ss:$8 sps:$4 sm:$0xff]  }
 0x17a   : >> { %1326 = vmatmul.mubr.bf16.gmra.mrb[80].mxu1 %v3297_v1 }
 0x17b   : >> { %5116 = vst [vmem:[#allocation27_spill] sm:$0xff] %v3795_v5  ;;  %662 = vrot.lane.b32.xlu1 %v3745_v25, %s3448_s28 }
 0x17d   : >> { %688 = vrot.lane.b32.xlu0 %v3737_v18, %s3449_s4  ;;  %v2786_v9 = vpop.f32.mrb[24].mxu0  ;;  %v2828_v10 = vpop.f32.mrb[24].mxu1 }
 0x17e   : >> { %v2787_v14 = vpop.f32.mrb[25].mxu0  ;;  %v2829_v15 = vpop.f32.mrb[25].mxu1 }
 0x17f   : >> { %690 = vrot.lane.b32.xlu1 %v3743_v24, %s3449_s4  ;;  %v3807_v16 = vadd.f32 %v2787_v14, %v2786_v9  ;;  %v2789_v17 = vpop.f32.mrb[26].mxu0  ;;  %v3809_v19 = vadd.f32 %v2829_v15, %v2828_v10  ;;  %v2831_v21 = vpop.f32.mrb[26].mxu1 }
 0x180   : >> { %v2790_v22 = vpop.f32.mrb[27].mxu0  ;;  %v2832_v23 = vpop.f32.mrb[27].mxu1 }
 0x181   : >> { %5117 = vst [vmem:[#allocation28_spill] sm:$0xff] %v3807_v16  ;;  %716 = vrot.lane.b32.xlu0 %v3739_v20, %s3449_s4  ;;  %v3813_v26 = vadd.f32 %v2790_v22, %v2789_v17  ;;  %v3815_v27 = vadd.f32 %v2832_v23, %v2831_v21 }
 0x183   : >> { %5118 = vst [vmem:[#allocation29_spill] sm:$0xff] %v3813_v26  ;;  %718 = vrot.lane.b32.xlu1 %v3745_v25, %s3449_s4 }
 0x185   : >> { %772 = vrot.lane.b32.xlu0 %v3739_v20, %s3450_s5  ;;  %v2850_v31 = vpop.f32.mrb[28].mxu1  ;;  %v2950_v33 = vpop.f32.mrb[28].mxu0 }
 0x186   : >> { %v2851_v34 = vpop.f32.mrb[29].mxu1  ;;  %v2951_v35 = vpop.f32.mrb[29].mxu0 }
 0x187   : >> { %774 = vrot.lane.b32.xlu1 %v3745_v25, %s3450_s5  ;;  %v3825_v36 = vadd.f32 %v2851_v34, %v2850_v31  ;;  %v2853_v39 = vpop.f32.mrb[30].mxu1  ;;  %v3827_v40 = vadd.f32 %v2951_v35, %v2950_v33  ;;  %v2953_v41 = vpop.f32.mrb[30].mxu0 }
 0x188   : >> { %v2854_v42 = vpop.f32.mrb[31].mxu1  ;;  %v2954_v43 = vpop.f32.mrb[31].mxu0 }
 0x189   : >> { %5119 = vst [vmem:[#allocation30_spill] sm:$0xff] %v3827_v40  ;;  %828 = vrot.lane.b32.xlu0 %v3739_v20, %s3451_s6  ;;  %v3831_v45 = vadd.f32 %v2854_v42, %v2853_v39  ;;  %v3833_v47 = vadd.f32 %v2954_v43, %v2953_v41 }
 0x18b   : >> { %5120 = vst [vmem:[#allocation31_spill] sm:$0xff] %v3833_v47  ;;  %830 = vrot.lane.b32.xlu1 %v3745_v25, %s3451_s6 }
 0x18d   : >> { %636 = vrot.lane.b32.xlu0 %v3753_v30, %s3448_s28  ;;  %v2856_v48 = vpop.f32.mrb[32].mxu1  ;;  %v2956_v49 = vpop.f32.mrb[32].mxu0 }
 0x18e   : >> { %v2857_v50 = vpop.f32.mrb[33].mxu1  ;;  %v2957_v53 = vpop.f32.mrb[33].mxu0 }
 0x18f   : >> { %638 = vrot.lane.b32.xlu1 %v3760_v37, %s3448_s28  ;;  %v3842_v57 = vadd.f32 %v2857_v50, %v2856_v48  ;;  %v2859_v58 = vpop.f32.mrb[34].mxu1  ;;  %v3844_v59 = vadd.f32 %v2957_v53, %v2956_v49  ;;  %v2959_v63 = vpop.f32.mrb[34].mxu0 }
 0x190   : >> { %v2860_v2 = vpop.f32.mrb[35].mxu1  ;;  %v2960_v3 = vpop.f32.mrb[35].mxu0 }
 0x191   : >> { %5121 = vst [vmem:[#allocation32_spill] sm:$0xff] %v3842_v57  ;;  %5122 = vst [vmem:[#allocation33_spill] sm:$0xff] %v3844_v59  ;;  %664 = vrot.lane.b32.xlu0 %v3755_v32, %s3448_s28  ;;  %v3849_v8 = vadd.f32 %v2860_v2, %v2859_v58  ;;  %v3851_v9 = vadd.f32 %v2960_v3, %v2959_v63 }
 0x193   : >> { %5123 = vst [vmem:[#allocation34_spill] sm:$0xff] %v3849_v8  ;;  %5124 = vst [vmem:[#allocation35_spill] sm:$0xff] %v3851_v9  ;;  %666 = vrot.lane.b32.xlu1 %v3762_v38, %s3448_s28 }
 0x195   : >> { %692 = vrot.lane.b32.xlu0 %v3753_v30, %s3449_s4  ;;  %v2862_v10 = vpop.f32.mrb[36].mxu1  ;;  %v2962_v13 = vpop.f32.mrb[36].mxu0 }
 0x196   : >> { %v2863_v14 = vpop.f32.mrb[37].mxu1  ;;  %v2963_v15 = vpop.f32.mrb[37].mxu0 }
 0x197   : >> { %694 = vrot.lane.b32.xlu1 %v3760_v37, %s3449_s4  ;;  %v3859_v17 = vadd.f32 %v2863_v14, %v2862_v10  ;;  %v2865_v21 = vpop.f32.mrb[38].mxu1  ;;  %v3861_v22 = vadd.f32 %v2963_v15, %v2962_v13  ;;  %v2965_v23 = vpop.f32.mrb[38].mxu0  ;;  %v3298_v13 = vld [vmem:[%s3633_s23 + $0x284] ss:$8 sps:$4 sm:$0xff]   ;;  %v3300_v15 = vld [vmem:[%s3633_s23 + $0x280] ss:$8 sps:$4 sm:$0xff]  }
 0x198   : >> { %v2866_v28 = vpop.f32.mrb[39].mxu1  ;;  %v2966_v29 = vpop.f32.mrb[39].mxu0  ;;  %2063 = vmatprep.mubr.bf16.mxu0 %v3298_v13 }
 0x199   : >> { %5125 = vst [vmem:[#allocation36_spill] sm:$0xff] %v3859_v17  ;;  %5126 = vst [vmem:[#allocation37_spill] sm:$0xff] %v3861_v22  ;;  %720 = vrot.lane.b32.xlu0 %v3755_v32, %s3449_s4  ;;  %v3865_v31 = vadd.f32 %v2866_v28, %v2865_v21  ;;  %v3867_v33 = vadd.f32 %v2966_v29, %v2965_v23  ;;  %2064 = vmatmul.mubr.bf16.gmra.mrb[76].mxu0 %v3300_v15 }
 0x19b   : >> { %5127 = vst [vmem:[#allocation38_spill] sm:$0xff] %v3865_v31  ;;  %5128 = vst [vmem:[#allocation39_spill] sm:$0xff] %v3867_v33  ;;  %722 = vrot.lane.b32.xlu1 %v3762_v38, %s3449_s4 }
 0x19d   : >> { %748 = vrot.lane.b32.xlu0 %v3753_v30, %s3450_s5  ;;  %v2868_v34 = vpop.f32.mrb[40].mxu1  ;;  %v2968_v35 = vpop.f32.mrb[40].mxu0 }
 0x19e   : >> { %v2869_v39 = vpop.f32.mrb[41].mxu1  ;;  %v2969_v41 = vpop.f32.mrb[41].mxu0 }
 0x19f   : >> { %750 = vrot.lane.b32.xlu1 %v3760_v37, %s3450_s5  ;;  %v3875_v42 = vadd.f32 %v2869_v39, %v2868_v34  ;;  %v2871_v43 = vpop.f32.mrb[42].mxu1  ;;  %v3877_v48 = vadd.f32 %v2969_v41, %v2968_v35  ;;  %v2971_v49 = vpop.f32.mrb[42].mxu0 }
 0x1a0   : >> { %v2872_v50 = vpop.f32.mrb[43].mxu1  ;;  %v2972_v53 = vpop.f32.mrb[43].mxu0 }
 0x1a1   : >> { %5129 = vst [vmem:[#allocation40_spill] sm:$0xff] %v3875_v42  ;;  %5130 = vst [vmem:[#allocation41_spill] sm:$0xff] %v3877_v48  ;;  %776 = vrot.lane.b32.xlu0 %v3755_v32, %s3450_s5  ;;  %v3881_v55 = vadd.f32 %v2872_v50, %v2871_v43  ;;  %v3883_v58 = vadd.f32 %v2972_v53, %v2971_v49 }
 0x1a3   : >> { %5131 = vst [vmem:[#allocation42_spill] sm:$0xff] %v3881_v55  ;;  %5132 = vst [vmem:[#allocation43_spill] sm:$0xff] %v3883_v58  ;;  %778 = vrot.lane.b32.xlu1 %v3762_v38, %s3450_s5 }
 0x1a5   : >> { %832 = vrot.lane.b32.xlu0 %v3755_v32, %s3451_s6  ;;  %v2874_v63 = vpop.f32.mrb[44].mxu1  ;;  %v2974_v21 = vpop.f32.mrb[44].mxu0 }
 0x1a6   : >> { %v2875_v1 = vpop.f32.mrb[45].mxu1  ;;  %v2975_v32 = vpop.f32.mrb[45].mxu0 }
 0x1a7   : >> { %834 = vrot.lane.b32.xlu1 %v3762_v38, %s3451_s6  ;;  %v3891_v2 = vadd.f32 %v2875_v1, %v2874_v63  ;;  %v2877_v3 = vpop.f32.mrb[46].mxu1  ;;  %v3901_v23 = vadd.f32 %v2975_v32, %v2974_v21  ;;  %v2977_v38 = vpop.f32.mrb[46].mxu0 }
 0x1a8   : >> { %v2878_v10 = vpop.f32.mrb[47].mxu1  ;;  %v2978_v28 = vpop.f32.mrb[47].mxu0 }
 0x1a9   : >> { %640 = vrot.lane.b32.xlu0 %v3771_v44, %s3448_s28  ;;  %v3896_v14 = vadd.f32 %v2878_v10, %v2877_v3  ;;  %v3905_v29 = vadd.f32 %v2978_v28, %v2977_v38 }
 0x1ab   : >> { %642 = vrot.lane.b32.xlu1 %v3778_v51, %s3448_s28 }
 0x1ad   : >> { %696 = vrot.lane.b32.xlu0 %v3771_v44, %s3449_s4  ;;  %v2880_v34 = vpop.f32.mrb[48].mxu1  ;;  %v2980_v63 = vpop.f32.mrb[48].mxu0 }
 0x1ae   : >> { %v2881_v35 = vpop.f32.mrb[49].mxu1  ;;  %v2981_v3 = vpop.f32.mrb[49].mxu0 }
 0x1af   : >> { %698 = vrot.lane.b32.xlu1 %v3778_v51, %s3449_s4  ;;  %v3917_v39 = vadd.f32 %v2881_v35, %v2880_v34  ;;  %v2883_v41 = vpop.f32.mrb[50].mxu1  ;;  %v3943_v10 = vadd.f32 %v2981_v3, %v2980_v63 }
 0x1b0   : >> { %v2884_v43 = vpop.f32.mrb[51].mxu1 }
 0x1b1   : >> { %724 = vrot.lane.b32.xlu0 %v3773_v46, %s3449_s4  ;;  %v3921_v49 = vadd.f32 %v2884_v43, %v2883_v41  ;;  %v3301_v43 = vld [vmem:[%s3633_s23 + $0x294] ss:$8 sps:$4 sm:$0xff]  }
 0x1b2   : >> { %2071 = vmatprep.mubr.bf16.mxu0 %v3301_v43 }
 0x1b3   : >> { %726 = vrot.lane.b32.xlu1 %v3780_v52, %s3449_s4 }
 0x1b5   : >> { %752 = vrot.lane.b32.xlu0 %v3771_v44, %s3450_s5  ;;  %v2886_v38 = vpop.f32.mrb[52].mxu1 }
 0x1b6   : >> { %v2887_v34 = vpop.f32.mrb[53].mxu1 }
 0x1b7   : >> { %754 = vrot.lane.b32.xlu1 %v3778_v51, %s3450_s5  ;;  %v3963_v35 = vadd.f32 %v2887_v34, %v2886_v38  ;;  %v2889_v41 = vpop.f32.mrb[54].mxu1 }
 0x1b8   : >> { %v2890_v3 = vpop.f32.mrb[55].mxu1 }
 0x1b9   : >> { %780 = vrot.lane.b32.xlu0 %v3773_v46, %s3450_s5 }
 0x1bb   : >> { %782 = vrot.lane.b32.xlu1 %v3780_v52, %s3450_s5 }
 0x1bd   : >> { %808 = vrot.lane.b32.xlu0 %v3771_v44, %s3451_s6 }
 0x1bf   : >> { %810 = vrot.lane.b32.xlu1 %v3778_v51, %s3451_s6 }
 0x1c1   : >> { %836 = vrot.lane.b32.xlu0 %v3773_v46, %s3451_s6  ;;  %v2983_v46 = vpop.f32.mrb[50].mxu0 }
 0x1c3   : >> { %v3931_v50 = vpop.permute.xlu0 %652  ;;  %838 = vrot.lane.b32.xlu1 %v3780_v52, %s3451_s6  ;;  %v2984_v52 = vpop.f32.mrb[51].mxu0 }
 0x1c4   : >> { %5133 = vst [vmem:[#allocation44_spill] sm:$0xff] %v3931_v50  ;;  %v3949_v15 = vadd.f32 %v2984_v52, %v2983_v46  ;;  %v3303_v46 = vld [vmem:[%s3633_s23 + $0x290] ss:$8 sps:$4 sm:$0xff]   ;;  %v3971_v52 = vadd.f32 %v2890_v3, %v2889_v41  ;;  %v2986_v3 = vpop.f32.mrb[52].mxu0 }
 0x1c5   : >> { %v3935_v53 = vpop.permute.xlu1 %654  ;;  %644 = vrot.lane.b32.xlu0 %v3789_v60, %s3448_s28  ;;  %2072 = vmatmul.mubr.bf16.gmra.mrb[80].mxu0 %v3303_v46  ;;  %v2987_v11 = vpop.f32.mrb[53].mxu0 }
 0x1c6   : >> { %5134 = vst [vmem:[#allocation45_spill] sm:$0xff] %v3935_v53  ;;  %v4001_v4 = vadd.f32 %v2987_v11, %v2986_v3  ;;  %v2892_v11 = vpop.f32.mrb[56].mxu1 }
 0x1c7   : >> { %v3939_v1 = vpop.permute.xlu0 %708  ;;  %646 = vrot.lane.b32.xlu1 %v3795_v5, %s3448_s28 }
 0x1c8   : >> { %5135 = vst [vmem:[#allocation46_spill] sm:$0xff] %v3939_v1 }
 0x1c9   : >> { %v3945_v13 = vpop.permute.xlu1 %710  ;;  %700 = vrot.lane.b32.xlu0 %v3789_v60, %s3449_s4 }
 0x1ca   : >> { %5136 = vst [vmem:[#allocation47_spill] sm:$0xff] %v3945_v13 }
 0x1cb   : >> { %v3951_v21 = vpop.permute.xlu0 %764  ;;  %702 = vrot.lane.b32.xlu1 %v3795_v5, %s3449_s4 }
 0x1cc   : >> { %5137 = vst [vmem:[#allocation48_spill] sm:$0xff] %v3951_v21 }
 0x1cd   : >> { %v3955_v32 = vpop.permute.xlu1 %766  ;;  %756 = vrot.lane.b32.xlu0 %v3789_v60, %s3450_s5 }
 0x1ce   : >> { %5138 = vst [vmem:[#allocation49_spill] sm:$0xff] %v3955_v32 }
 0x1cf   : >> { %v3959_v28 = vpop.permute.xlu0 %820  ;;  %758 = vrot.lane.b32.xlu1 %v3795_v5, %s3450_s5 }
 0x1d0   : >> { %5139 = vst [vmem:[#allocation50_spill] sm:$0xff] %v3959_v28 }
 0x1d1   : >> { %v3966_v63 = vpop.permute.xlu1 %822  ;;  %784 = vrot.lane.b32.xlu0 %v3791_v0, %s3450_s5 }
 0x1d2   : >> { %5140 = vst [vmem:[#allocation51_spill] sm:$0xff] %v3966_v63 }
 0x1d3   : >> { %786 = vrot.lane.b32.xlu1 %v3797_v7, %s3450_s5  ;;  %v3975_v25 = vpop.permute.xlu0 %628 }
 0x1d5   : >> { %v3977_v38 = vpop.permute.xlu1 %658  ;;  %812 = vrot.lane.b32.xlu0 %v3789_v60, %s3451_s6 }
 0x1d6   : >> { %5141 = vst [vmem:[#allocation52_spill] sm:$0xff] %v3977_v38 }
 0x1d7   : >> { %814 = vrot.lane.b32.xlu1 %v3795_v5, %s3451_s6  ;;  %v3983_v34 = vpop.permute.xlu0 %656 }
 0x1d8   : >> { %5142 = vst [vmem:[#allocation53_spill] sm:$0xff] %v3983_v34 }
 0x1d9   : >> { %v3985_v20 = vpop.permute.xlu1 %714  ;;  %840 = vrot.lane.b32.xlu0 %v3791_v0, %s3451_s6  ;;  %v2989_v0 = vpop.f32.mrb[54].mxu0 }
 0x1da   : >> { %5143 = vst [vmem:[#allocation54_spill] sm:$0xff] %v3985_v20 }
 0x1db   : >> { %842 = vrot.lane.b32.xlu1 %v3797_v7, %s3451_s6  ;;  %v3991_v41 = vpop.permute.xlu0 %712  ;;  %v2990_v7 = vpop.f32.mrb[55].mxu0 }
 0x1dc   : >> { %5144 = vst [vmem:[#allocation55_spill] sm:$0xff] %v3991_v41  ;;  %v4007_v38 = vadd.f32 %v2990_v7, %v2989_v0 }
 0x1dd   : >> { %v3993_v43 = vpop.permute.xlu1 %770  ;;  %648 = vrot.lane.b32.xlu0 %v3807_v16, %s3448_s28 }
 0x1de   : >> { %5145 = vst [vmem:[#allocation56_spill] sm:$0xff] %v3993_v43 }
 0x1df   : >> { %650 = vrot.lane.b32.xlu1 %v3813_v26, %s3448_s28  ;;  %v3999_v46 = vpop.permute.xlu0 %768 }
 0x1e0   : >> { %5146 = vst [vmem:[#allocation57_spill] sm:$0xff] %v3999_v46 }
 0x1e1   : >> { %v4003_v61 = vpop.permute.xlu1 %826  ;;  %704 = vrot.lane.b32.xlu0 %v3807_v16, %s3449_s4 }
 0x1e2   : >> { %5147 = vst [vmem:[#allocation58_spill] sm:$0xff] %v4003_v61  ;;  %v2893_v61 = vpop.f32.mrb[57].mxu1 }
 0x1e3   : >> { %706 = vrot.lane.b32.xlu1 %v3813_v26, %s3449_s4  ;;  %v4011_v54 = vpop.permute.xlu0 %824  ;;  %v4021_v43 = vadd.f32 %v2893_v61, %v2892_v11  ;;  %v2895_v0 = vpop.f32.mrb[58].mxu1 }
 0x1e4   : >> { %5148 = vst [vmem:[#allocation59_spill] sm:$0xff] %v4011_v54  ;;  %v2896_v54 = vpop.f32.mrb[59].mxu1 }
 0x1e5   : >> { %v4013_v34 = vpop.permute.xlu1 %632  ;;  %760 = vrot.lane.b32.xlu0 %v3807_v16, %s3450_s5  ;;  %v4027_v46 = vadd.f32 %v2896_v54, %v2895_v0 }
 0x1e6   : >> { %5149 = vst [vmem:[#allocation60_spill] sm:$0xff] %v4013_v34 }
 0x1e7   : >> { %762 = vrot.lane.b32.xlu1 %v3813_v26, %s3450_s5  ;;  %v4019_v3 = vpop.permute.xlu0 %630 }
 0x1e9   : >> { %v4023_v7 = vpop.permute.xlu1 %634  ;;  %816 = vrot.lane.b32.xlu0 %v3807_v16, %s3451_s6 }
 0x1ea   : >> { %5150 = vst [vmem:[#allocation61_spill] sm:$0xff] %v4023_v7 }
 0x1eb   : >> { %818 = vrot.lane.b32.xlu1 %v3813_v26, %s3451_s6  ;;  %v4031_v63 = vpop.permute.xlu0 %660 }
 0x1ec   : >> { %5151 = vst [vmem:[#allocation62_spill] sm:$0xff] %v4031_v63 }
 0x1ed   : >> { %v4033_v32 = vpop.permute.xlu1 %662  ;;  %844 = vrot.lane.b32.xlu0 %v3809_v19, %s3451_s6  ;;  %v2992_v19 = vpop.f32.mrb[56].mxu0 }
 0x1ee   : >> { %5152 = vst [vmem:[#allocation63_spill] sm:$0xff] %v4033_v32  ;;  %v2993_v32 = vpop.f32.mrb[57].mxu0 }
 0x1ef   : >> { %846 = vrot.lane.b32.xlu1 %v3815_v27, %s3451_s6  ;;  %v4039_v61 = vpop.permute.xlu0 %688  ;;  %v4057_v63 = vadd.f32 %v2993_v32, %v2992_v19  ;;  %v2995_v28 = vpop.f32.mrb[58].mxu0 }
 0x1f0   : >> { %v2898_v32 = vpop.f32.mrb[60].mxu1 }
 0x1f1   : >> { %v4041_v11 = vpop.permute.xlu1 %690  ;;  %1334 = vrot.lane.b32.xlu0 %v3842_v57, %s3448_s28 }
 0x1f3   : >> { %1336 = vrot.lane.b32.xlu1 %v3849_v8, %s3448_s28  ;;  %v4047_v54 = vpop.permute.xlu0 %716  ;;  %v2899_v8 = vpop.f32.mrb[61].mxu1 }
 0x1f4   : >> { %5153 = vst [vmem:[#allocation64_spill] sm:$0xff] %v4047_v54  ;;  %v2996_v54 = vpop.f32.mrb[59].mxu0  ;;  %v4077_v57 = vadd.f32 %v2899_v8, %v2898_v32 }
 0x1f5   : >> { %v4049_v0 = vpop.permute.xlu1 %718  ;;  %2080 = vrot.lane.b32.xlu0 %v3844_v59, %s3448_s28 }
 0x1f6   : >> { %5154 = vst [vmem:[#allocation65_spill] sm:$0xff] %v4049_v0  ;;  %v4063_v0 = vadd.f32 %v2996_v54, %v2995_v28  ;;  %v2901_v28 = vpop.f32.mrb[62].mxu1 }
 0x1f7   : >> { %2082 = vrot.lane.b32.xlu1 %v3851_v9, %s3448_s28  ;;  %v4055_v27 = vpop.permute.xlu0 %772 }
 0x1f8   : >> { %5155 = vst [vmem:[#allocation66_spill] sm:$0xff] %v4055_v27 }
 0x1f9   : >> { %v4059_v47 = vpop.permute.xlu1 %774  ;;  %1338 = vrot.lane.b32.xlu0 %v3859_v17, %s3448_s28 }
 0x1fa   : >> { %5156 = vst [vmem:[#allocation67_spill] sm:$0xff] %v4059_v47 }
 0x1fb   : >> { %1340 = vrot.lane.b32.xlu1 %v3865_v31, %s3448_s28  ;;  %v4067_v59 = vpop.permute.xlu0 %828 }
 0x1fc   : >> { %5157 = vst [vmem:[#allocation68_spill] sm:$0xff] %v4067_v59  ;;  %v2902_v59 = vpop.f32.mrb[63].mxu1 }
 0x1fd   : >> { %v4069_v9 = vpop.permute.xlu1 %830  ;;  %1394 = vrot.lane.b32.xlu0 %v3859_v17, %s3449_s4 }
 0x1fe   : >> { %5158 = vst [vmem:[#allocation69_spill] sm:$0xff] %v4069_v9  ;;  %v4083_v9 = vadd.f32 %v2902_v59, %v2901_v28 }
 0x1ff   : >> { %1396 = vrot.lane.b32.xlu1 %v3865_v31, %s3449_s4  ;;  %v4075_v19 = vpop.permute.xlu0 %636 }
 0x200   : >> { %5159 = vst [vmem:[#allocation70_spill] sm:$0xff] %v4075_v19 }
 0x201   : >> { %v4079_v54 = vpop.permute.xlu1 %638  ;;  %2084 = vrot.lane.b32.xlu0 %v3861_v22, %s3448_s28 }
 0x202   : >> { %5160 = vst [vmem:[#allocation71_spill] sm:$0xff] %v4079_v54 }
 0x203   : >> { %2086 = vrot.lane.b32.xlu1 %v3867_v33, %s3448_s28  ;;  %v4087_v17 = vpop.permute.xlu0 %664 }
 0x204   : >> { %5161 = vst [vmem:[#allocation72_spill] sm:$0xff] %v4087_v17 }
 0x205   : >> { %v4089_v31 = vpop.permute.xlu1 %666  ;;  %2140 = vrot.lane.b32.xlu0 %v3861_v22, %s3449_s4 }
 0x206   : >> { %5162 = vst [vmem:[#allocation73_spill] sm:$0xff] %v4089_v31  ;;  %v2998_v31 = vpop.f32.mrb[60].mxu0 }
 0x207   : >> { %2142 = vrot.lane.b32.xlu1 %v3867_v33, %s3449_s4  ;;  %v4095_v8 = vpop.permute.xlu0 %692  ;;  %v2999_v33 = vpop.f32.mrb[61].mxu0 }
 0x208   : >> { %5163 = vst [vmem:[#allocation74_spill] sm:$0xff] %v4095_v8  ;;  %v4113_v22 = vadd.f32 %v2999_v33, %v2998_v31  ;;  %v3001_v40 = vpop.f32.mrb[62].mxu0  ;;  %v2904_v31 = vpop.f32.mrb[64].mxu1 }
 0x209   : >> { %v4097_v32 = vpop.permute.xlu1 %694  ;;  %1342 = vrot.lane.b32.xlu0 %v3875_v42, %s3448_s28 }
 0x20a   : >> { %5164 = vst [vmem:[#allocation75_spill] sm:$0xff] %v4097_v32 }
 0x20b   : >> { %1344 = vrot.lane.b32.xlu1 %v3881_v55, %s3448_s28  ;;  %v4103_v59 = vpop.permute.xlu0 %720 }
 0x20c   : >> { %5165 = vst [vmem:[#allocation76_spill] sm:$0xff] %v4103_v59  ;;  %v3002_v59 = vpop.f32.mrb[63].mxu0 }
 0x20d   : >> { %v4105_v28 = vpop.permute.xlu1 %722  ;;  %1398 = vrot.lane.b32.xlu0 %v3875_v42, %s3449_s4 }
 0x20e   : >> { %5166 = vst [vmem:[#allocation77_spill] sm:$0xff] %v4105_v28  ;;  %v4119_v28 = vadd.f32 %v3002_v59, %v3001_v40 }
 0x20f   : >> { %1400 = vrot.lane.b32.xlu1 %v3881_v55, %s3449_s4  ;;  %v4111_v17 = vpop.permute.xlu0 %748 }
 0x211   : >> { %v4115_v21 = vpop.permute.xlu1 %750  ;;  %1454 = vrot.lane.b32.xlu0 %v3875_v42, %s3450_s5  ;;  %v2905_v42 = vpop.f32.mrb[65].mxu1 }
 0x212   : >> { %v4133_v51 = vadd.f32 %v2905_v42, %v2904_v31  ;;  %v2907_v40 = vpop.f32.mrb[66].mxu1 }
 0x213   : >> { %1456 = vrot.lane.b32.xlu1 %v3881_v55, %s3450_s5  ;;  %v4123_v13 = vpop.permute.xlu0 %776 }
 0x214   : >> { %5167 = vst [vmem:[#allocation78_spill] sm:$0xff] %v4123_v13  ;;  %v2908_v13 = vpop.f32.mrb[67].mxu1 }
 0x215   : >> { %v4125_v1 = vpop.permute.xlu1 %778  ;;  %2088 = vrot.lane.b32.xlu0 %v3877_v48, %s3448_s28 }
 0x216   : >> { %5168 = vst [vmem:[#allocation79_spill] sm:$0xff] %v4125_v1  ;;  %v4139_v1 = vadd.f32 %v2908_v13, %v2907_v40 }
 0x217   : >> { %2090 = vrot.lane.b32.xlu1 %v3883_v58, %s3448_s28  ;;  %v4131_v33 = vpop.permute.xlu0 %832 }
 0x218   : >> { %5169 = vst [vmem:[#allocation80_spill] sm:$0xff] %v4131_v33 }
 0x219   : >> { %v4135_v59 = vpop.permute.xlu1 %834  ;;  %2144 = vrot.lane.b32.xlu0 %v3877_v48, %s3449_s4 }
 0x21a   : >> { %5170 = vst [vmem:[#allocation81_spill] sm:$0xff] %v4135_v59 }
 0x21b   : >> { %2146 = vrot.lane.b32.xlu1 %v3883_v58, %s3449_s4  ;;  %v4143_v55 = vpop.permute.xlu0 %640 }
 0x21c   : >> { %5171 = vst [vmem:[#allocation82_spill] sm:$0xff] %v4143_v55 }
 0x21d   : >> { %v4145_v5 = vpop.permute.xlu1 %642  ;;  %2200 = vrot.lane.b32.xlu0 %v3877_v48, %s3450_s5  ;;  %v3004_v48 = vpop.f32.mrb[64].mxu0 }
 0x21e   : >> { %5172 = vst [vmem:[#allocation83_spill] sm:$0xff] %v4145_v5 }
 0x21f   : >> { %2202 = vrot.lane.b32.xlu1 %v3883_v58, %s3450_s5  ;;  %v4151_v42 = vpop.permute.xlu0 %696 }
 0x220   : >> { %5173 = vst [vmem:[#allocation84_spill] sm:$0xff] %v4151_v42 }
 0x221   : >> { %v4153_v31 = vpop.permute.xlu1 %698  ;;  %1346 = vrot.lane.b32.xlu0 %v3891_v2, %s3448_s28 }
 0x222   : >> { %5174 = vst [vmem:[#allocation85_spill] sm:$0xff] %v4153_v31  ;;  %v3005_v31 = vpop.f32.mrb[65].mxu0 }
 0x223   : >> { %1348 = vrot.lane.b32.xlu1 %v3896_v14, %s3448_s28  ;;  %v4159_v13 = vpop.permute.xlu0 %724  ;;  %v4169_v42 = vadd.f32 %v3005_v31, %v3004_v48  ;;  %v3007_v60 = vpop.f32.mrb[66].mxu0 }
 0x224   : >> { %5175 = vst [vmem:[#allocation86_spill] sm:$0xff] %v4159_v13  ;;  %v3008_v13 = vpop.f32.mrb[67].mxu0  ;;  %v2910_v48 = vpop.f32.mrb[68].mxu1 }
 0x225   : >> { %v4161_v40 = vpop.permute.xlu1 %726  ;;  %1402 = vrot.lane.b32.xlu0 %v3891_v2, %s3449_s4 }
 0x226   : >> { %5176 = vst [vmem:[#allocation87_spill] sm:$0xff] %v4161_v40  ;;  %v4175_v40 = vadd.f32 %v3008_v13, %v3007_v60 }
 0x227   : >> { %1404 = vrot.lane.b32.xlu1 %v3896_v14, %s3449_s4  ;;  %v4167_v58 = vpop.permute.xlu0 %752 }
 0x228   : >> { %5177 = vst [vmem:[#allocation88_spill] sm:$0xff] %v4167_v58 }
 0x229   : >> { %v4171_v37 = vpop.permute.xlu1 %754  ;;  %1458 = vrot.lane.b32.xlu0 %v3891_v2, %s3450_s5 }
 0x22a   : >> { %5178 = vst [vmem:[#allocation89_spill] sm:$0xff] %v4171_v37  ;;  %v2911_v37 = vpop.f32.mrb[69].mxu1 }
 0x22b   : >> { %1460 = vrot.lane.b32.xlu1 %v3896_v14, %s3450_s5  ;;  %v4179_v5 = vpop.permute.xlu0 %780  ;;  %v4189_v58 = vadd.f32 %v2911_v37, %v2910_v48  ;;  %v2913_v60 = vpop.f32.mrb[70].mxu1 }
 0x22c   : >> { %5179 = vst [vmem:[#allocation90_spill] sm:$0xff] %v4179_v5  ;;  %v2914_v5 = vpop.f32.mrb[71].mxu1 }
 0x22d   : >> { %v4181_v30 = vpop.permute.xlu1 %782  ;;  %1514 = vrot.lane.b32.xlu0 %v3891_v2, %s3451_s6 }
 0x22e   : >> { %5180 = vst [vmem:[#allocation91_spill] sm:$0xff] %v4181_v30  ;;  %v4195_v30 = vadd.f32 %v2914_v5, %v2913_v60 }
 0x22f   : >> { %1516 = vrot.lane.b32.xlu1 %v3896_v14, %s3451_s6  ;;  %v4187_v31 = vpop.permute.xlu0 %808 }
 0x231   : >> { %v4191_v13 = vpop.permute.xlu1 %810  ;;  %2092 = vrot.lane.b32.xlu0 %v3901_v23, %s3448_s28 }
 0x233   : >> { %2094 = vrot.lane.b32.xlu1 %v3905_v29, %s3448_s28  ;;  %v4199_v55 = vpop.permute.xlu0 %836 }
 0x234   : >> { %5181 = vst [vmem:[#allocation92_spill] sm:$0xff] %v4199_v55 }
 0x235   : >> { %v4201_v32 = vpop.permute.xlu1 %838  ;;  %2148 = vrot.lane.b32.xlu0 %v3901_v23, %s3449_s4 }
 0x236   : >> { %5182 = vst [vmem:[#allocation93_spill] sm:$0xff] %v4201_v32  ;;  %v3010_v32 = vpop.f32.mrb[68].mxu0 }
 0x237   : >> { %2150 = vrot.lane.b32.xlu1 %v3905_v29, %s3449_s4  ;;  %v4207_v37 = vpop.permute.xlu0 %644 }
 0x238   : >> { %5183 = vst [vmem:[#allocation94_spill] sm:$0xff] %v4207_v37 }
 0x239   : >> { %v4209_v48 = vpop.permute.xlu1 %646  ;;  %2204 = vrot.lane.b32.xlu0 %v3901_v23, %s3450_s5 }
 0x23a   : >> { %5184 = vst [vmem:[#allocation95_spill] sm:$0xff] %v4209_v48  ;;  %v3011_v48 = vpop.f32.mrb[69].mxu0 }
 0x23b   : >> { %2206 = vrot.lane.b32.xlu1 %v3905_v29, %s3450_s5  ;;  %v4215_v5 = vpop.permute.xlu0 %700  ;;  %v4225_v8 = vadd.f32 %v3011_v48, %v3010_v32  ;;  %v3013_v24 = vpop.f32.mrb[70].mxu0 }
 0x23c   : >> { %5185 = vst [vmem:[#allocation96_spill] sm:$0xff] %v4215_v5  ;;  %v3014_v5 = vpop.f32.mrb[71].mxu0  ;;  %v2916_v32 = vpop.f32.mrb[72].mxu1 }
 0x23d   : >> { %v4217_v60 = vpop.permute.xlu1 %702  ;;  %1350 = vrot.lane.b32.xlu0 %v3917_v39, %s3448_s28 }
 0x23e   : >> { %5186 = vst [vmem:[#allocation97_spill] sm:$0xff] %v4217_v60  ;;  %v4231_v60 = vadd.f32 %v3014_v5, %v3013_v24 }
 0x23f   : >> { %1352 = vrot.lane.b32.xlu1 %v3921_v49, %s3448_s28  ;;  %v4223_v55 = vpop.permute.xlu0 %756 }
 0x240   : >> { %5187 = vst [vmem:[#allocation98_spill] sm:$0xff] %v4223_v55 }
 0x241   : >> { %v4227_v54 = vpop.permute.xlu1 %758  ;;  %1406 = vrot.lane.b32.xlu0 %v3917_v39, %s3449_s4 }
 0x242   : >> { %5188 = vst [vmem:[#allocation99_spill] sm:$0xff] %v4227_v54  ;;  %v2917_v54 = vpop.f32.mrb[73].mxu1 }
 0x243   : >> { %1408 = vrot.lane.b32.xlu1 %v3921_v49, %s3449_s4  ;;  %v4235_v44 = vpop.permute.xlu0 %784  ;;  %v4245_v55 = vadd.f32 %v2917_v54, %v2916_v32  ;;  %v2919_v24 = vpop.f32.mrb[74].mxu1 }
 0x244   : >> { %5189 = vst [vmem:[#allocation100_spill] sm:$0xff] %v4235_v44  ;;  %v2920_v44 = vpop.f32.mrb[75].mxu1 }
 0x245   : >> { %v4237_v37 = vpop.permute.xlu1 %786  ;;  %1462 = vrot.lane.b32.xlu0 %v3917_v39, %s3450_s5  ;;  %v2922_v7 = vpop.f32.mrb[76].mxu1 }
 0x246   : >> { %5190 = vst [vmem:[#allocation101_spill] sm:$0xff] %v4237_v37  ;;  %v4251_v37 = vadd.f32 %v2920_v44, %v2919_v24  ;;  %v3016_v44 = vpop.f32.mrb[72].mxu0 }
 0x247   : >> { %1464 = vrot.lane.b32.xlu1 %v3921_v49, %s3450_s5  ;;  %v4243_v48 = vpop.permute.xlu0 %812 }
 0x248   : >> { %5191 = vst [vmem:[#allocation102_spill] sm:$0xff] %v4243_v48 }
 0x249   : >> { %v4247_v5 = vpop.permute.xlu1 %814  ;;  %1518 = vrot.lane.b32.xlu0 %v3917_v39, %s3451_s6 }
 0x24a   : >> { %5192 = vst [vmem:[#allocation103_spill] sm:$0xff] %v4247_v5 }
 0x24b   : >> { %1520 = vrot.lane.b32.xlu1 %v3921_v49, %s3451_s6  ;;  %v4255_v18 = vpop.permute.xlu0 %840 }
 0x24c   : >> { %5193 = vst [vmem:[#allocation104_spill] sm:$0xff] %v4255_v18 }
 0x24d   : >> { %v4257_v19 = vpop.permute.xlu1 %842  ;;  %2096 = vrot.lane.b32.xlu0 %v3943_v10, %s3448_s28 }
 0x24e   : >> { %5194 = vst [vmem:[#allocation105_spill] sm:$0xff] %v4257_v19  ;;  %v3017_v19 = vpop.f32.mrb[73].mxu0 }
 0x24f   : >> { %2098 = vrot.lane.b32.xlu1 %v3949_v15, %s3448_s28  ;;  %v4263_v54 = vpop.permute.xlu0 %648  ;;  %v4273_v18 = vadd.f32 %v3017_v19, %v3016_v44  ;;  %v3019_v5 = vpop.f32.mrb[74].mxu0 }
 0x250   : >> { %5195 = vst [vmem:[#allocation106_spill] sm:$0xff] %v4263_v54  ;;  %v3020_v54 = vpop.f32.mrb[75].mxu0  ;;  %v2923_v19 = vpop.f32.mrb[77].mxu1 }
 0x251   : >> { %v4265_v32 = vpop.permute.xlu1 %650  ;;  %2152 = vrot.lane.b32.xlu0 %v3943_v10, %s3449_s4  ;;  %v4289_v44 = vadd.f32 %v2923_v19, %v2922_v7 }
 0x252   : >> { %5196 = vst [vmem:[#allocation107_spill] sm:$0xff] %v4265_v32  ;;  %v4279_v32 = vadd.f32 %v3020_v54, %v3019_v5 }
 0x253   : >> { %2154 = vrot.lane.b32.xlu1 %v3949_v15, %s3449_s4  ;;  %v4271_v24 = vpop.permute.xlu0 %704 }
 0x254   : >> { %5197 = vst [vmem:[#allocation108_spill] sm:$0xff] %v4271_v24 }
 0x255   : >> { %v4275_v48 = vpop.permute.xlu1 %706  ;;  %1354 = vrot.lane.b32.xlu0 %v3963_v35, %s3448_s28 }
 0x256   : >> { %5198 = vst [vmem:[#allocation109_spill] sm:$0xff] %v4275_v48  ;;  %v2925_v48 = vpop.f32.mrb[78].mxu1 }
 0x257   : >> { %1356 = vrot.lane.b32.xlu1 %v3971_v52, %s3448_s28  ;;  %v4283_v12 = vpop.permute.xlu0 %760  ;;  %v2926_v54 = vpop.f32.mrb[79].mxu1 }
 0x258   : >> { %5199 = vst [vmem:[#allocation110_spill] sm:$0xff] %v4283_v12  ;;  %v4295_v24 = vadd.f32 %v2926_v54, %v2925_v48  ;;  %v2928_v19 = vpop.f32.mrb[80].mxu1 }
 0x259   : >> { %v4285_v6 = vpop.permute.xlu1 %762  ;;  %1410 = vrot.lane.b32.xlu0 %v3963_v35, %s3449_s4 }
 0x25a   : >> { %5200 = vst [vmem:[#allocation111_spill] sm:$0xff] %v4285_v6 }
 0x25b   : >> { %1412 = vrot.lane.b32.xlu1 %v3971_v52, %s3449_s4  ;;  %v4293_v5 = vpop.permute.xlu0 %816 }
 0x25c   : >> { %5201 = vst [vmem:[#allocation112_spill] sm:$0xff] %v4293_v5 }
 0x25d   : >> { %v4297_v34 = vpop.permute.xlu1 %818  ;;  %1466 = vrot.lane.b32.xlu0 %v3963_v35, %s3450_s5 }
 0x25e   : >> { %5202 = vst [vmem:[#allocation113_spill] sm:$0xff] %v4297_v34  ;;  %v2929_v34 = vpop.f32.mrb[81].mxu1 }
 0x25f   : >> { %1468 = vrot.lane.b32.xlu1 %v3971_v52, %s3450_s5  ;;  %v4303_v6 = vpop.permute.xlu0 %844  ;;  %v4317_v5 = vadd.f32 %v2929_v34, %v2928_v19 }
 0x260   : >> { %5203 = vst [vmem:[#allocation114_spill] sm:$0xff] %v4303_v6  ;;  %v2931_v6 = vpop.f32.mrb[82].mxu1 }
 0x261   : >> { %v4305_v7 = vpop.permute.xlu1 %846  ;;  %1522 = vrot.lane.b32.xlu0 %v3963_v35, %s3451_s6  ;;  %v2932_v12 = vpop.f32.mrb[83].mxu1 }
 0x262   : >> { %5204 = vst [vmem:[#allocation115_spill] sm:$0xff] %v4305_v7  ;;  %v4323_v59 = vadd.f32 %v2932_v12, %v2931_v6 }
 0x263   : >> { %1524 = vrot.lane.b32.xlu1 %v3971_v52, %s3451_s6  ;;  %v4311_v48 = vpop.permute.xlu0 %1334 }
 0x265   : >> { %v4313_v54 = vpop.permute.xlu1 %1336  ;;  %2100 = vrot.lane.b32.xlu0 %v4001_v4, %s3448_s28 }
 0x267   : >> { %2102 = vrot.lane.b32.xlu1 %v4007_v38, %s3448_s28  ;;  %v4321_v7 = vpop.permute.xlu0 %2080 }
 0x268   : >> { %5205 = vst [vmem:[#allocation116_spill] sm:$0xff] %v4321_v7 }
 0x269   : >> { %v4325_v33 = vpop.permute.xlu1 %2082  ;;  %2156 = vrot.lane.b32.xlu0 %v4001_v4, %s3449_s4 }
 0x26a   : >> { %5206 = vst [vmem:[#allocation117_spill] sm:$0xff] %v4325_v33 }
 0x26b   : >> { %2158 = vrot.lane.b32.xlu1 %v4007_v38, %s3449_s4  ;;  %v4331_v47 = vpop.permute.xlu0 %1338 }
 0x26c   : >> { %5207 = vst [vmem:[#allocation118_spill] sm:$0xff] %v4331_v47 }
 0x26d   : >> { %v4333_v34 = vpop.permute.xlu1 %1340  ;;  %1358 = vrot.lane.b32.xlu0 %v4021_v43, %s3448_s28 }
 0x26e   : >> { %5208 = vst [vmem:[#allocation119_spill] sm:$0xff] %v4333_v34 }
 0x26f   : >> { %1360 = vrot.lane.b32.xlu1 %v4027_v46, %s3448_s28  ;;  %v1395_v6 = vpop.permute.xlu0 %1394 }
 0x271   : >> { %v1397_v12 = vpop.permute.xlu1 %1396  ;;  %1414 = vrot.lane.b32.xlu0 %v4021_v43, %s3449_s4 }
 0x273   : >> { %1416 = vrot.lane.b32.xlu1 %v4027_v46, %s3449_s4  ;;  %v4343_v19 = vpop.permute.xlu0 %2084 }
 0x274   : >> { %5209 = vst [vmem:[#allocation120_spill] sm:$0xff] %v4343_v19 }
 0x275   : >> { %v4345_v33 = vpop.permute.xlu1 %2086  ;;  %1470 = vrot.lane.b32.xlu0 %v4021_v43, %s3450_s5 }
 0x276   : >> { %5210 = vst [vmem:[#allocation121_spill] sm:$0xff] %v4345_v33  ;;  %v3022_v33 = vpop.f32.mrb[76].mxu0 }
 0x277   : >> { %1472 = vrot.lane.b32.xlu1 %v4027_v46, %s3450_s5  ;;  %v4351_v34 = vpop.permute.xlu0 %2140 }
 0x278   : >> { %5211 = vst [vmem:[#allocation122_spill] sm:$0xff] %v4351_v34 }
 0x279   : >> { %v4353_v47 = vpop.permute.xlu1 %2142  ;;  %1526 = vrot.lane.b32.xlu0 %v4021_v43, %s3451_s6 }
 0x27a   : >> { %5212 = vst [vmem:[#allocation123_spill] sm:$0xff] %v4353_v47  ;;  %v3023_v47 = vpop.f32.mrb[77].mxu0 }
 0x27b   : >> { %1528 = vrot.lane.b32.xlu1 %v4027_v46, %s3451_s6  ;;  %v4359_v7 = vpop.permute.xlu0 %1342  ;;  %v4369_v27 = vadd.f32 %v3023_v47, %v3022_v33  ;;  %v3025_v20 = vpop.f32.mrb[78].mxu0 }
 0x27c   : >> { %5213 = vst [vmem:[#allocation124_spill] sm:$0xff] %v4359_v7  ;;  %v3026_v7 = vpop.f32.mrb[79].mxu0 }
 0x27d   : >> { %v4361_v19 = vpop.permute.xlu1 %1344  ;;  %2104 = vrot.lane.b32.xlu0 %v4057_v63, %s3448_s28 }
 0x27e   : >> { %5214 = vst [vmem:[#allocation125_spill] sm:$0xff] %v4361_v19  ;;  %v4375_v19 = vadd.f32 %v3026_v7, %v3025_v20 }
 0x27f   : >> { %2106 = vrot.lane.b32.xlu1 %v4063_v0, %s3448_s28  ;;  %v4367_v34 = vpop.permute.xlu0 %1398 }
 0x280   : >> { %5215 = vst [vmem:[#allocation126_spill] sm:$0xff] %v4367_v34  ;;  %v669_v34 = vadd.f32 %v3710_v62, %v4019_v3 }
 0x281   : >> { %v4371_v41 = vpop.permute.xlu1 %1400  ;;  %2160 = vrot.lane.b32.xlu0 %v4057_v63, %s3449_s4 }
 0x282   : >> { %5216 = vst [vmem:[#allocation127_spill] sm:$0xff] %v4371_v41 }
 0x283   : >> { %2162 = vrot.lane.b32.xlu1 %v4063_v0, %s3449_s4  ;;  %v1455_v26 = vpop.permute.xlu0 %1454 }
 0x285   : >> { %v1457_v53 = vpop.permute.xlu1 %1456  ;;  %1362 = vrot.lane.b32.xlu0 %v4077_v57, %s3448_s28 }
 0x287   : >> { %1364 = vrot.lane.b32.xlu1 %v4083_v9, %s3448_s28  ;;  %v4383_v47 = vpop.permute.xlu0 %2088 }
 0x288   : >> { %5217 = vst [vmem:[#allocation128_spill] sm:$0xff] %v4383_v47 }
 0x289   : >> { %v4385_v33 = vpop.permute.xlu1 %2090  ;;  %1418 = vrot.lane.b32.xlu0 %v4077_v57, %s3449_s4 }
 0x28a   : >> { %5218 = vst [vmem:[#allocation129_spill] sm:$0xff] %v4385_v33 }
 0x28b   : >> { %1420 = vrot.lane.b32.xlu1 %v4083_v9, %s3449_s4  ;;  %v4391_v20 = vpop.permute.xlu0 %2144 }
 0x28c   : >> { %5219 = vst [vmem:[#allocation130_spill] sm:$0xff] %v4391_v20 }
 0x28d   : >> { %v4393_v7 = vpop.permute.xlu1 %2146  ;;  %1474 = vrot.lane.b32.xlu0 %v4077_v57, %s3450_s5 }
 0x28e   : >> { %5220 = vst [vmem:[#allocation131_spill] sm:$0xff] %v4393_v7 }
 0x28f   : >> { %1476 = vrot.lane.b32.xlu1 %v4083_v9, %s3450_s5  ;;  %v4399_v41 = vpop.permute.xlu0 %2200 }
 0x290   : >> { %5221 = vst [vmem:[#allocation132_spill] sm:$0xff] %v4399_v41 }
 0x291   : >> { %v4401_v47 = vpop.permute.xlu1 %2202  ;;  %1530 = vrot.lane.b32.xlu0 %v4077_v57, %s3451_s6 }
 0x292   : >> { %5222 = vst [vmem:[#allocation133_spill] sm:$0xff] %v4401_v47  ;;  %v668_v47 = vadd.f32 %v3703_v56, %v3975_v25  ;;  %v729_v56 = vadd.f32 %v4041_v11, %v669_v34 }
 0x293   : >> { %1532 = vrot.lane.b32.xlu1 %v4083_v9, %s3451_s6  ;;  %v4407_v33 = vpop.permute.xlu0 %1346 }
 0x294   : >> { %5223 = vst [vmem:[#allocation134_spill] sm:$0xff] %v4407_v33  ;;  %v1374_v33 = vadd.f32 %v3825_v36, %v4311_v48  ;;  %v789_v3 = vadd.f32 %v4115_v21, %v729_v56 }
 0x295   : >> { %v4409_v20 = vpop.permute.xlu1 %1348  ;;  %2108 = vrot.lane.b32.xlu0 %v4113_v22, %s3448_s28 }
 0x296   : >> { %5224 = vst [vmem:[#allocation135_spill] sm:$0xff] %v4409_v20  ;;  %v1434_v16 = vadd.f32 %v1395_v6, %v1374_v33  ;;  %v849_v11 = vadd.f32 %v4191_v13, %v789_v3 }
 0x297   : >> { %2110 = vrot.lane.b32.xlu1 %v4119_v28, %s3448_s28  ;;  %v4415_v7 = vpop.permute.xlu0 %1402 }
 0x298   : >> { %5225 = vst [vmem:[#allocation136_spill] sm:$0xff] %v4415_v7  ;;  %v728_v7 = vadd.f32 %v4039_v61, %v668_v47  ;;  %v1494_v48 = vadd.f32 %v1455_v26, %v1434_v16 }
 0x299   : >> { %v4417_v41 = vpop.permute.xlu1 %1404  ;;  %2164 = vrot.lane.b32.xlu0 %v4113_v22, %s3449_s4 }
 0x29a   : >> { %5226 = vst [vmem:[#allocation137_spill] sm:$0xff] %v4417_v41  ;;  %v1375_v41 = vadd.f32 %v3831_v45, %v4313_v54  ;;  %v788_v25 = vadd.f32 %v4111_v17, %v728_v7 }
 0x29b   : >> { %2166 = vrot.lane.b32.xlu1 %v4119_v28, %s3449_s4  ;;  %v4427_v20 = vpop.permute.xlu0 %1458 }
 0x29c   : >> { %v1435_v36 = vadd.f32 %v1397_v12, %v1375_v41  ;;  %v848_v45 = vadd.f32 %v4187_v31, %v788_v25 }
 0x29d   : >> { %v4434_v50 = vpop.permute.xlu1 %1460  ;;  %1366 = vrot.lane.b32.xlu0 %v4133_v51, %s3448_s28 }
 0x29e   : >> { %v1495_v61 = vadd.f32 %v1457_v53, %v1435_v36  ;;  %v3028_v53 = vpop.f32.mrb[80].mxu0 }
 0x29f   : >> { %1368 = vrot.lane.b32.xlu1 %v4139_v1, %s3448_s28  ;;  %v1515_v62 = vpop.permute.xlu0 %1514  ;;  %v3029_v31 = vpop.f32.mrb[81].mxu0 }
 0x2a0   : >> { %v1554_v54 = vadd.f32 %v1515_v62, %v1494_v48  ;;  %v4463_v13 = vadd.f32 %v3029_v31, %v3028_v53  ;;  %v3031_v12 = vpop.f32.mrb[82].mxu0 }
 0x2a1   : >> { %v1517_v6 = vpop.permute.xlu1 %1516  ;;  %1422 = vrot.lane.b32.xlu0 %v4133_v51, %s3449_s4  ;;  %v3032_v33 = vpop.f32.mrb[83].mxu0 }
 0x2a2   : >> { %v4447_v34 = vadd.f32 %v1554_v54, %v848_v45  ;;  %v1555_v17 = vadd.f32 %v1517_v6, %v1495_v61  ;;  %v4469_v7 = vadd.f32 %v3032_v33, %v3031_v12 }
 0x2a3   : >> { %1424 = vrot.lane.b32.xlu1 %v4139_v1, %s3449_s4  ;;  %v4451_v16 = vpop.permute.xlu0 %2092 }
 0x2a4   : >> { %5227 = vst [vmem:[#allocation138_spill] sm:$0xff] %v4447_v34  ;;  %v4453_v26 = vadd.f32 %v1555_v17, %v849_v11 }
 0x2a5   : >> { %v4455_v21 = vpop.permute.xlu1 %2094  ;;  %1478 = vrot.lane.b32.xlu0 %v4133_v51, %s3450_s5 }
 0x2a6   : >> { %5228 = vst [vmem:[#allocation139_spill] sm:$0xff] %v4453_v26  ;;  %5229 = vst [vmem:[#allocation140_spill] sm:$0xff] %v4455_v21 }
 0x2a7   : >> { %1480 = vrot.lane.b32.xlu1 %v4139_v1, %s3450_s5  ;;  %v4461_v41 = vpop.permute.xlu0 %2148 }
 0x2a8   : >> { %5230 = vst [vmem:[#allocation141_spill] sm:$0xff] %v4461_v41 }
 0x2a9   : >> { %v4465_v47 = vpop.permute.xlu1 %2150  ;;  %1534 = vrot.lane.b32.xlu0 %v4133_v51, %s3451_s6 }
 0x2aa   : >> { %5231 = vst [vmem:[#allocation142_spill] sm:$0xff] %v4465_v47 }
 0x2ab   : >> { %1536 = vrot.lane.b32.xlu1 %v4139_v1, %s3451_s6  ;;  %v4473_v56 = vpop.permute.xlu0 %2204 }
 0x2ad   : >> { %v4475_v25 = vpop.permute.xlu1 %2206  ;;  %2112 = vrot.lane.b32.xlu0 %v4169_v42, %s3448_s28 }
 0x2ae   : >> { %5232 = vst [vmem:[#allocation143_spill] sm:$0xff] %v4475_v25 }
 0x2af   : >> { %2114 = vrot.lane.b32.xlu1 %v4175_v40, %s3448_s28  ;;  %v4481_v36 = vpop.permute.xlu0 %1350 }
 0x2b0   : >> { %v1382_v25 = vadd.f32 %v3891_v2, %v4481_v36 }
 0x2b1   : >> { %v4483_v48 = vpop.permute.xlu1 %1352  ;;  %2168 = vrot.lane.b32.xlu0 %v4169_v42, %s3449_s4 }
 0x2b3   : >> { %2170 = vrot.lane.b32.xlu1 %v4175_v40, %s3449_s4  ;;  %v4489_v62 = vpop.permute.xlu0 %1406 }
 0x2b4   : >> { %5233 = vst [vmem:[#allocation144_spill] sm:$0xff] %v4489_v62 }
 0x2b5   : >> { %v4491_v3 = vpop.permute.xlu1 %1408  ;;  %1370 = vrot.lane.b32.xlu0 %v4189_v58, %s3448_s28 }
 0x2b6   : >> { %5234 = vst [vmem:[#allocation145_spill] sm:$0xff] %v4491_v3 }
 0x2b7   : >> { %1372 = vrot.lane.b32.xlu1 %v4195_v30, %s3448_s28  ;;  %v4497_v45 = vpop.permute.xlu0 %1462 }
 0x2b9   : >> { %v4499_v61 = vpop.permute.xlu1 %1464  ;;  %1426 = vrot.lane.b32.xlu0 %v4189_v58, %s3449_s4 }
 0x2ba   : >> { %5235 = vst [vmem:[#allocation146_spill] sm:$0xff] %v4499_v61 }
 0x2bb   : >> { %1428 = vrot.lane.b32.xlu1 %v4195_v30, %s3449_s4  ;;  %v4505_v54 = vpop.permute.xlu0 %1518 }
 0x2bd   : >> { %v4507_v6 = vpop.permute.xlu1 %1520  ;;  %1482 = vrot.lane.b32.xlu0 %v4189_v58, %s3450_s5 }
 0x2bf   : >> { %1484 = vrot.lane.b32.xlu1 %v4195_v30, %s3450_s5  ;;  %v4513_v11 = vpop.permute.xlu0 %2096 }
 0x2c0   : >> { %5236 = vst [vmem:[#allocation147_spill] sm:$0xff] %v4513_v11 }
 0x2c1   : >> { %v4515_v17 = vpop.permute.xlu1 %2098  ;;  %1538 = vrot.lane.b32.xlu0 %v4189_v58, %s3451_s6 }
 0x2c2   : >> { %5237 = vst [vmem:[#allocation148_spill] sm:$0xff] %v4515_v17 }
 0x2c3   : >> { %1540 = vrot.lane.b32.xlu1 %v4195_v30, %s3451_s6  ;;  %v4521_v53 = vpop.permute.xlu0 %2152 }
 0x2c4   : >> { %5238 = vst [vmem:[#allocation149_spill] sm:$0xff] %v4521_v53 }
 0x2c5   : >> { %v4523_v31 = vpop.permute.xlu1 %2154  ;;  %2116 = vrot.lane.b32.xlu0 %v4225_v8, %s3448_s28 }
 0x2c6   : >> { %5239 = vst [vmem:[#allocation150_spill] sm:$0xff] %v4523_v31 }
 0x2c7   : >> { %2118 = vrot.lane.b32.xlu1 %v4231_v60, %s3448_s28  ;;  %v1355_v12 = vpop.permute.xlu0 %1354 }
 0x2c9   : >> { %v1357_v33 = vpop.permute.xlu1 %1356  ;;  %2172 = vrot.lane.b32.xlu0 %v4225_v8, %s3449_s4 }
 0x2ca   : >> { %v1385_v41 = vadd.f32 %v3921_v49, %v1357_v33 }
 0x2cb   : >> { %2174 = vrot.lane.b32.xlu1 %v4231_v60, %s3449_s4  ;;  %v1411_v58 = vpop.permute.xlu0 %1410 }
 0x2cd   : >> { %v4533_v30 = vpop.permute.xlu1 %1412  ;;  %1430 = vrot.lane.b32.xlu0 %v4245_v55, %s3449_s4 }
 0x2cf   : >> { %1432 = vrot.lane.b32.xlu1 %v4251_v37, %s3449_s4  ;;  %v4539_v17 = vpop.permute.xlu0 %1466 }
 0x2d0   : >> { %5240 = vst [vmem:[#allocation151_spill] sm:$0xff] %v4539_v17 }
 0x2d1   : >> { %v4541_v31 = vpop.permute.xlu1 %1468  ;;  %1486 = vrot.lane.b32.xlu0 %v4245_v55, %s3450_s5 }
 0x2d2   : >> { %5241 = vst [vmem:[#allocation152_spill] sm:$0xff] %v4541_v31 }
 0x2d3   : >> { %1488 = vrot.lane.b32.xlu1 %v4251_v37, %s3450_s5  ;;  %v4547_v11 = vpop.permute.xlu0 %1522 }
 0x2d4   : >> { %5242 = vst [vmem:[#allocation153_spill] sm:$0xff] %v4547_v11 }
 0x2d5   : >> { %v4549_v53 = vpop.permute.xlu1 %1524  ;;  %1542 = vrot.lane.b32.xlu0 %v4245_v55, %s3451_s6 }
 0x2d6   : >> { %5243 = vst [vmem:[#allocation154_spill] sm:$0xff] %v4549_v53 }
 0x2d7   : >> { %1544 = vrot.lane.b32.xlu1 %v4251_v37, %s3451_s6  ;;  %v4555_v21 = vpop.permute.xlu0 %2100 }
 0x2d8   : >> { %5244 = vst [vmem:[#allocation155_spill] sm:$0xff] %v4555_v21 }
 0x2d9   : >> { %v4557_v17 = vpop.permute.xlu1 %2102  ;;  %2176 = vrot.lane.b32.xlu0 %v4273_v18, %s3449_s4 }
 0x2da   : >> { %5245 = vst [vmem:[#allocation156_spill] sm:$0xff] %v4557_v17 }
 0x2db   : >> { %2178 = vrot.lane.b32.xlu1 %v4279_v32, %s3449_s4  ;;  %v4563_v31 = vpop.permute.xlu0 %2156 }
 0x2dc   : >> { %5246 = vst [vmem:[#allocation157_spill] sm:$0xff] %v4563_v31 }
 0x2dd   : >> { %v4565_v3 = vpop.permute.xlu1 %2158  ;;  %1490 = vrot.lane.b32.xlu0 %v4289_v44, %s3450_s5 }
 0x2de   : >> { %5247 = vst [vmem:[#allocation158_spill] sm:$0xff] %v4565_v3 }
 0x2df   : >> { %2210 = vrot.lane.b32.xlu1 %v3949_v15, %s3450_s5  ;;  %v1359_v55 = vpop.permute.xlu0 %1358 }
 0x2e1   : >> { %v1361_v37 = vpop.permute.xlu1 %1360  ;;  %1546 = vrot.lane.b32.xlu0 %v4289_v44, %s3451_s6 }
 0x2e3   : >> { %1492 = vrot.lane.b32.xlu1 %v4295_v24, %s3450_s5  ;;  %v1415_v17 = vpop.permute.xlu0 %1414 }
 0x2e5   : >> { %v1417_v21 = vpop.permute.xlu1 %1416  ;;  %2208 = vrot.lane.b32.xlu0 %v3943_v10, %s3450_s5 }
 0x2e7   : >> { %1548 = vrot.lane.b32.xlu1 %v4295_v24, %s3451_s6  ;;  %v1471_v3 = vpop.permute.xlu0 %1470 }
 0x2e9   : >> { %v1473_v31 = vpop.permute.xlu1 %1472  ;;  %1550 = vrot.lane.b32.xlu0 %v4317_v5, %s3451_s6 }
 0x2eb   : >> { %2214 = vrot.lane.b32.xlu1 %v4007_v38, %s3450_s5  ;;  %v4583_v44 = vpop.permute.xlu0 %1526 }
 0x2ec   : >> { %5248 = vst [vmem:[#allocation159_spill] sm:$0xff] %v4583_v44  ;;  %v1386_v44 = vadd.f32 %v3963_v35, %v1359_v55 }
 0x2ed   : >> { %v4585_v53 = vpop.permute.xlu1 %1528  ;;  %2212 = vrot.lane.b32.xlu0 %v4001_v4, %s3450_s5 }
 0x2ee   : >> { %5249 = vst [vmem:[#allocation160_spill] sm:$0xff] %v4585_v53 }
 0x2ef   : >> { %1552 = vrot.lane.b32.xlu1 %v4323_v59, %s3451_s6  ;;  %v2105_v47 = vpop.permute.xlu0 %2104 }
 0x2f1   : >> { %v2107_v24 = vpop.permute.xlu1 %2106  ;;  %2216 = vrot.lane.b32.xlu0 %v4057_v63, %s3450_s5 }
 0x2f3   : >> { %2218 = vrot.lane.b32.xlu1 %v4063_v0, %s3450_s5  ;;  %v4595_v5 = vpop.permute.xlu0 %2160 }
 0x2f4   : >> { %5250 = vst [vmem:[#allocation161_spill] sm:$0xff] %v4595_v5  ;;  %v1384_v5 = vadd.f32 %v3917_v39, %v1355_v12  ;;  %v1383_v39 = vadd.f32 %v3896_v14, %v4483_v48  ;;  %v2133_v48 = vadd.f32 %v4007_v38, %v2107_v24 }
 0x2f5   : >> { %v4597_v26 = vpop.permute.xlu1 %2162  ;;  %2220 = vrot.lane.b32.xlu0 %v4113_v22, %s3450_s5 }
 0x2f6   : >> { %5251 = vst [vmem:[#allocation162_spill] sm:$0xff] %v4597_v26  ;;  %v1387_v26 = vadd.f32 %v3971_v52, %v1361_v37  ;;  %v1444_v34 = vadd.f32 %v1415_v17, %v1384_v5  ;;  %v1442_v52 = vadd.f32 %v1411_v58, %v1382_v25  ;;  %v1443_v2 = vadd.f32 %v4533_v30, %v1383_v39 }
 0x2f7   : >> { %2222 = vrot.lane.b32.xlu1 %v4119_v28, %s3450_s5  ;;  %v1363_v53 = vpop.permute.xlu0 %1362 }
 0x2f8   : >> { %v1502_v36 = vadd.f32 %v1471_v3, %v1442_v52 }
 0x2f9   : >> { %v1365_v59 = vpop.permute.xlu1 %1364  ;;  %2224 = vrot.lane.b32.xlu0 %v4169_v42, %s3450_s5 }
 0x2fa   : >> { %v1389_v5 = vadd.f32 %v4027_v46, %v1365_v59 }
 0x2fb   : >> { %2226 = vrot.lane.b32.xlu1 %v4175_v40, %s3450_s5  ;;  %v1419_v62 = vpop.permute.xlu0 %1418 }
 0x2fc   : >> { %v1446_v11 = vadd.f32 %v1419_v62, %v1386_v44  ;;  %v1445_v62 = vadd.f32 %v1417_v21, %v1385_v41  ;;  %v2132_v41 = vadd.f32 %v4001_v4, %v2105_v47  ;;  %v1388_v47 = vadd.f32 %v4021_v43, %v1363_v53 }
 0x2fd   : >> { %v1421_v61 = vpop.permute.xlu1 %1420  ;;  %2228 = vrot.lane.b32.xlu0 %v4225_v8, %s3450_s5 }
 0x2fe   : >> { %v1447_v35 = vadd.f32 %v1421_v61, %v1387_v26  ;;  %v1503_v61 = vadd.f32 %v1473_v31, %v1443_v2 }
 0x2ff   : >> { %2230 = vrot.lane.b32.xlu1 %v4231_v60, %s3450_s5  ;;  %v1475_v55 = vpop.permute.xlu0 %1474 }
 0x300   : >> { %v1504_v12 = vadd.f32 %v1475_v55, %v1444_v34 }
 0x301   : >> { %v1477_v37 = vpop.permute.xlu1 %1476  ;;  %2232 = vrot.lane.b32.xlu0 %v4273_v18, %s3450_s5 }
 0x302   : >> { %v1505_v49 = vadd.f32 %v1477_v37, %v1445_v62 }
 0x303   : >> { %2234 = vrot.lane.b32.xlu1 %v4279_v32, %s3450_s5  ;;  %v1531_v26 = vpop.permute.xlu0 %1530 }
 0x304   : >> { %v4624_v17 = vadd.f32 %v1531_v26, %v1502_v36 }
 0x305   : >> { %v1533_v33 = vpop.permute.xlu1 %1532  ;;  %2236 = vrot.lane.b32.xlu0 %v4369_v27, %s3450_s5 }
 0x306   : >> { %v4628_v14 = vadd.f32 %v1533_v33, %v1503_v61 }
 0x307   : >> { %2238 = vrot.lane.b32.xlu1 %v4375_v19, %s3450_s5  ;;  %v2109_v34 = vpop.permute.xlu0 %2108 }
 0x309   : >> { %v2111_v21 = vpop.permute.xlu1 %2110  ;;  %2260 = vrot.lane.b32.xlu0 %v3901_v23, %s3451_s6 }
 0x30a   : >> { %v2135_v36 = vadd.f32 %v4063_v0, %v2111_v21  ;;  %v5254_v21 = vld [vmem:[#allocation44_spill] sm:$0xff] }
 0x30b   : >> { %2262 = vrot.lane.b32.xlu1 %v3905_v29, %s3451_s6  ;;  %v2165_v25 = vpop.permute.xlu0 %2164 }
 0x30c   : >> { %v4638_v3 = vadd.f32 %v2165_v25, %v2132_v41 }
 0x30d   : >> { %v2167_v31 = vpop.permute.xlu1 %2166  ;;  %2264 = vrot.lane.b32.xlu0 %v3943_v10, %s3451_s6 }
 0x30e   : >> { %v4642_v58 = vadd.f32 %v2167_v31, %v2133_v48  ;;  %v5257_v48 = vld [vmem:[#allocation29_spill] sm:$0xff] }
 0x30f   : >> { %2266 = vrot.lane.b32.xlu1 %v3949_v15, %s3451_s6  ;;  %v1367_v30 = vpop.permute.xlu0 %1366 }
 0x311   : >> { %v1369_v44 = vpop.permute.xlu1 %1368  ;;  %2268 = vrot.lane.b32.xlu0 %v4001_v4, %s3451_s6 }
 0x313   : >> { %2270 = vrot.lane.b32.xlu1 %v4007_v38, %s3451_s6  ;;  %v1423_v24 = vpop.permute.xlu0 %1422 }
 0x314   : >> { %v1448_v55 = vadd.f32 %v1423_v24, %v1388_v47 }
 0x315   : >> { %v1425_v39 = vpop.permute.xlu1 %1424  ;;  %2272 = vrot.lane.b32.xlu0 %v4057_v63, %s3451_s6 }
 0x316   : >> { %v1449_v52 = vadd.f32 %v1425_v39, %v1389_v5  ;;  %v5260_v5 = vld [vmem:[#allocation66_spill] sm:$0xff] }
 0x317   : >> { %2274 = vrot.lane.b32.xlu1 %v4063_v0, %s3451_s6  ;;  %v1479_v62 = vpop.permute.xlu0 %1478 }
 0x318   : >> { %v1506_v37 = vadd.f32 %v1479_v62, %v1446_v11 }
 0x319   : >> { %v1481_v4 = vpop.permute.xlu1 %1480  ;;  %2276 = vrot.lane.b32.xlu0 %v4113_v22, %s3451_s6 }
 0x31a   : >> { %v1507_v43 = vadd.f32 %v1481_v4, %v1447_v35  ;;  %v2134_v35 = vadd.f32 %v4057_v63, %v2109_v34  ;;  %v1390_v63 = vadd.f32 %v4077_v57, %v1367_v30  ;;  %v5256_v57 = vld [vmem:[#allocation45_spill] sm:$0xff]  ;;  %v5261_v4 = vld [vmem:[#allocation67_spill] sm:$0xff] }
 0x31b   : >> { %2278 = vrot.lane.b32.xlu1 %v4119_v28, %s3451_s6  ;;  %v1535_v38 = vpop.permute.xlu0 %1534  ;;  %v681_v31 = vadd.f32 %v5257_v48, %v5256_v57 }
 0x31c   : >> { %v4660_v46 = vadd.f32 %v1535_v38, %v1504_v12 }
 0x31d   : >> { %v1537_v53 = vpop.permute.xlu1 %1536  ;;  %2280 = vrot.lane.b32.xlu0 %v4169_v42, %s3451_s6 }
 0x31e   : >> { %v4664_v59 = vadd.f32 %v1537_v53, %v1505_v49  ;;  %v5262_v53 = vld [vmem:[#allocation80_spill] sm:$0xff] }
 0x31f   : >> { %2282 = vrot.lane.b32.xlu1 %v4175_v40, %s3451_s6  ;;  %v2113_v11 = vpop.permute.xlu0 %2112 }
 0x321   : >> { %v2115_v2 = vpop.permute.xlu1 %2114  ;;  %2284 = vrot.lane.b32.xlu0 %v4225_v8, %s3451_s6 }
 0x323   : >> { %2286 = vrot.lane.b32.xlu1 %v4231_v60, %s3451_s6  ;;  %v2169_v12 = vpop.permute.xlu0 %2168  ;;  %v1391_v60 = vadd.f32 %v4083_v9, %v1369_v44  ;;  %v5259_v44 = vld [vmem:[#allocation54_spill] sm:$0xff] }
 0x324   : >> { %v4674_v26 = vadd.f32 %v2169_v12, %v2134_v35  ;;  %v741_v24 = vadd.f32 %v5259_v44, %v681_v31 }
 0x325   : >> { %v2171_v49 = vpop.permute.xlu1 %2170  ;;  %2288 = vrot.lane.b32.xlu0 %v4273_v18, %s3451_s6 }
 0x326   : >> { %5252 = vst [vmem:[#allocation163_spill] sm:$0xff] %v4674_v26  ;;  %v4678_v61 = vadd.f32 %v2171_v49, %v2135_v36  ;;  %v801_v38 = vadd.f32 %v5261_v4, %v741_v24  ;;  %v5263_v36 = vld [vmem:[#allocation81_spill] sm:$0xff] }
 0x327   : >> { %2290 = vrot.lane.b32.xlu1 %v4279_v32, %s3451_s6  ;;  %v1371_v8 = vpop.permute.xlu0 %1370  ;;  %v5255_v32 = vld [vmem:[#allocation28_spill] sm:$0xff] }
 0x328   : >> { %5253 = vst [vmem:[#allocation164_spill] sm:$0xff] %v4678_v61  ;;  %v680_v41 = vadd.f32 %v5255_v32, %v5254_v21  ;;  %v861_v49 = vadd.f32 %v5263_v36, %v801_v38  ;;  %v2136_v21 = vadd.f32 %v4113_v22, %v2113_v11  ;;  %v5340_v61 = vld [vmem:[#allocation36_spill] sm:$0xff] }
 0x329   : >> { %v1373_v33 = vpop.permute.xlu1 %1372  ;;  %2292 = vrot.lane.b32.xlu0 %v4369_v27, %s3451_s6 }
 0x32a   : >> { %v1393_v31 = vadd.f32 %v4139_v1, %v1373_v33 }
 0x32b   : >> { %2294 = vrot.lane.b32.xlu1 %v4375_v19, %s3451_s6  ;;  %v1427_v0 = vpop.permute.xlu0 %1426  ;;  %v5258_v19 = vld [vmem:[#allocation55_spill] sm:$0xff] }
 0x32c   : >> { %v1450_v34 = vadd.f32 %v1427_v0, %v1390_v63  ;;  %v740_v30 = vadd.f32 %v5258_v19, %v680_v41 }
 0x32d   : >> { %v1429_v18 = vpop.permute.xlu1 %1428  ;;  %2296 = vrot.lane.b32.xlu0 %v4463_v13, %s3451_s6 }
 0x32e   : >> { %v1451_v25 = vadd.f32 %v1429_v18, %v1391_v60  ;;  %v800_v39 = vadd.f32 %v5260_v5, %v740_v30 }
 0x32f   : >> { %2298 = vrot.lane.b32.xlu1 %v4469_v7, %s3451_s6  ;;  %v1483_v27 = vpop.permute.xlu0 %1482 }
 0x330   : >> { %v1508_v47 = vadd.f32 %v1483_v27, %v1448_v55  ;;  %v860_v35 = vadd.f32 %v5262_v53, %v800_v39 }
 0x331   : >> { %v1485_v9 = vpop.permute.xlu1 %1484 }
 0x332   : >> { %v1509_v13 = vadd.f32 %v1485_v9, %v1449_v52  ;;  %v2137_v52 = vadd.f32 %v4119_v28, %v2115_v2 }
 0x333   : >> { %v1539_v62 = vpop.permute.xlu0 %1538 }
 0x334   : >> { %v1566_v12 = vadd.f32 %v1539_v62, %v1506_v37  ;;  %v1392_v37 = vadd.f32 %v4133_v51, %v1371_v8 }
 0x335   : >> { %v1541_v7 = vpop.permute.xlu1 %1540 }
 0x336   : >> { %v4702_v63 = vadd.f32 %v1566_v12, %v860_v35  ;;  %v1567_v0 = vadd.f32 %v1541_v7, %v1507_v43 }
 0x337   : >> { %v2117_v60 = vpop.permute.xlu0 %2116 }
 0x338   : >> { %5264 = vst [vmem:[#allocation44_spill] sm:$0xff] %v4702_v63  ;;  %v4704_v55 = vadd.f32 %v1567_v0, %v861_v49  ;;  %v2138_v2 = vadd.f32 %v4169_v42, %v2117_v60 }
 0x339   : >> { %v2119_v18 = vpop.permute.xlu1 %2118 }
 0x33a   : >> { %5265 = vst [vmem:[#allocation28_spill] sm:$0xff] %v4704_v55  ;;  %v2139_v8 = vadd.f32 %v4175_v40, %v2119_v18 }
 0x33b   : >> { %v2173_v32 = vpop.permute.xlu0 %2172 }
 0x33c   : >> { %v4708_v41 = vadd.f32 %v2173_v32, %v2136_v21 }
 0x33d   : >> { %v2175_v27 = vpop.permute.xlu1 %2174 }
 0x33e   : >> { %5266 = vst [vmem:[#allocation45_spill] sm:$0xff] %v4708_v41  ;;  %v4711_v57 = vadd.f32 %v2175_v27, %v2137_v52 }
 0x33f   : >> { %v1431_v48 = vpop.permute.xlu0 %1430 }
 0x340   : >> { %5267 = vst [vmem:[#allocation29_spill] sm:$0xff] %v4711_v57  ;;  %v1452_v43 = vadd.f32 %v1431_v48, %v1392_v37  ;;  %v5278_v37 = vld [vmem:[#allocation60_spill] sm:$0xff]  ;;  %v5279_v48 = vld [vmem:[#allocation15_spill] sm:$0xff] }
 0x341   : >> { %v1433_v19 = vpop.permute.xlu1 %1432  ;;  %v5307_v57 = vld [vmem:[#allocation96_spill] sm:$0xff] }
 0x342   : >> { %v1453_v30 = vadd.f32 %v1433_v19, %v1393_v31  ;;  %v670_v31 = vadd.f32 %v5279_v48, %v5278_v37  ;;  %v5281_v19 = vld [vmem:[#allocation17_spill] sm:$0xff]  ;;  %v5293_v48 = vld [vmem:[#allocation83_spill] sm:$0xff] }
 0x343   : >> { %v1487_v9 = vpop.permute.xlu0 %1486 }
 0x344   : >> { %v1510_v44 = vadd.f32 %v1487_v9, %v1450_v34  ;;  %v5282_v9 = vld [vmem:[#allocation70_spill] sm:$0xff] }
 0x345   : >> { %v1489_v24 = vpop.permute.xlu1 %1488 }
 0x346   : >> { %v1511_v22 = vadd.f32 %v1489_v24, %v1451_v25 }
 0x347   : >> { %v1543_v11 = vpop.permute.xlu0 %1542 }
 0x348   : >> { %v4714_v5 = vadd.f32 %v1543_v11, %v1508_v47  ;;  %v5285_v11 = vld [vmem:[#allocation24_spill] sm:$0xff] }
 0x349   : >> { %v1545_v28 = vpop.permute.xlu1 %1544 }
 0x34a   : >> { %5268 = vst [vmem:[#allocation55_spill] sm:$0xff] %v4714_v5  ;;  %v4717_v39 = vadd.f32 %v1545_v28, %v1509_v13  ;;  %v5342_v5 = vld [vmem:[#allocation38_spill] sm:$0xff] }
 0x34b   : >> { %v2177_v51 = vpop.permute.xlu0 %2176 }
 0x34c   : >> { %5269 = vst [vmem:[#allocation54_spill] sm:$0xff] %v4717_v39  ;;  %v4720_v62 = vadd.f32 %v2177_v51, %v2138_v2  ;;  %v5287_v51 = vld [vmem:[#allocation71_spill] sm:$0xff] }
 0x34d   : >> { %v2179_v1 = vpop.permute.xlu1 %2178  ;;  %v5335_v39 = vld [vmem:[#allocation35_spill] sm:$0xff] }
 0x34e   : >> { %5270 = vst [vmem:[#allocation66_spill] sm:$0xff] %v4720_v62  ;;  %v4722_v33 = vadd.f32 %v2179_v1, %v2139_v8  ;;  %v5288_v8 = vld [vmem:[#allocation20_spill] sm:$0xff] }
 0x34f   : >> { %v1491_v4 = vpop.permute.xlu0 %1490  ;;  %v673_v1 = vadd.f32 %v5288_v8, %v5287_v51  ;;  %v5299_v62 = vld [vmem:[#allocation108_spill] sm:$0xff]  ;;  %v5302_v8 = vld [vmem:[#allocation85_spill] sm:$0xff] }
 0x350   : >> { %5271 = vst [vmem:[#allocation67_spill] sm:$0xff] %v4722_v33  ;;  %v1512_v34 = vadd.f32 %v1491_v4, %v1452_v43  ;;  %v5280_v43 = vld [vmem:[#allocation61_spill] sm:$0xff]  ;;  %v5289_v4 = vld [vmem:[#allocation74_spill] sm:$0xff]  ;;  %v5301_v51 = vld [vmem:[#allocation84_spill] sm:$0xff] }
 0x351   : >> { %v4724_v38 = vpop.permute.xlu1 %2210  ;;  %v5295_v33 = vld [vmem:[#allocation106_spill] sm:$0xff] }
 0x353   : >> { %v1547_v25 = vpop.permute.xlu0 %1546 }
 0x354   : >> { %v4726_v47 = vadd.f32 %v1547_v25, %v1510_v44  ;;  %v5283_v44 = vld [vmem:[#allocation18_spill] sm:$0xff]  ;;  %v5290_v25 = vld [vmem:[#allocation75_spill] sm:$0xff] }
 0x355   : >> { %v1493_v53 = vpop.permute.xlu1 %1492  ;;  %v672_v24 = vadd.f32 %v5283_v44, %v5282_v9  ;;  %v5296_v9 = vld [vmem:[#allocation26_spill] sm:$0xff] }
 0x356   : >> { %5272 = vst [vmem:[#allocation80_spill] sm:$0xff] %v4726_v47  ;;  %v4728_v35 = vadd.f32 %v1493_v53, %v1453_v30  ;;  %v671_v30 = vadd.f32 %v5281_v19, %v5280_v43  ;;  %v5294_v43 = vld [vmem:[#allocation23_spill] sm:$0xff]  ;;  %v678_v44 = vadd.f32 %v5296_v9, %v5295_v33  ;;  %v5308_v9 = vld [vmem:[#allocation97_spill] sm:$0xff] }
 0x357   : >> { %v4730_v42 = vpop.permute.xlu0 %2208  ;;  %v675_v19 = vadd.f32 %v5294_v43, %v5293_v48  ;;  %v5306_v48 = vld [vmem:[#allocation25_spill] sm:$0xff] }
 0x358   : >> { %5273 = vst [vmem:[#allocation81_spill] sm:$0xff] %v4728_v35  ;;  %v731_v53 = vadd.f32 %v5290_v25, %v671_v30  ;;  %v733_v30 = vadd.f32 %v5302_v8, %v673_v1  ;;  %v5313_v1 = vld [vmem:[#allocation103_spill] sm:$0xff] }
 0x359   : >> { %v1549_v13 = vpop.permute.xlu1 %1548  ;;  %v735_v47 = vadd.f32 %v5308_v9, %v675_v19 }
 0x35a   : >> { %v4732_v12 = vadd.f32 %v1549_v13, %v1511_v22  ;;  %v5284_v22 = vld [vmem:[#allocation94_spill] sm:$0xff] }
 0x35b   : >> { %v1551_v40 = vpop.permute.xlu0 %1550  ;;  %v676_v28 = vadd.f32 %v5285_v11, %v5284_v22  ;;  %v5291_v13 = vld [vmem:[#allocation82_spill] sm:$0xff]  ;;  %v5298_v22 = vld [vmem:[#allocation27_spill] sm:$0xff] }
 0x35c   : >> { %5274 = vst [vmem:[#allocation165_spill] sm:$0xff] %v4732_v12  ;;  %v4734_v7 = vadd.f32 %v1551_v40, %v1512_v34  ;;  %v730_v34 = vadd.f32 %v5289_v4, %v670_v31  ;;  %v5292_v40 = vld [vmem:[#allocation22_spill] sm:$0xff]  ;;  %v732_v31 = vadd.f32 %v5301_v51, %v672_v24  ;;  %v5303_v4 = vld [vmem:[#allocation88_spill] sm:$0xff]  ;;  %v5305_v12 = vld [vmem:[#allocation95_spill] sm:$0xff] }
 0x35d   : >> { %v4736_v36 = vpop.permute.xlu1 %2214  ;;  %v674_v37 = vadd.f32 %v5292_v40, %v5291_v13  ;;  %v5304_v13 = vld [vmem:[#allocation89_spill] sm:$0xff]  ;;  %v677_v43 = vadd.f32 %v5306_v48, %v5305_v12  ;;  %v5312_v24 = vld [vmem:[#allocation102_spill] sm:$0xff]  ;;  %v5316_v12 = vld [vmem:[#allocation48_spill] sm:$0xff] }
 0x35e   : >> { %5275 = vst [vmem:[#allocation166_spill] sm:$0xff] %v4734_v7  ;;  %v5297_v7 = vld [vmem:[#allocation107_spill] sm:$0xff]  ;;  %v790_v25 = vadd.f32 %v5303_v4, %v730_v34  ;;  %v791_v40 = vadd.f32 %v5304_v13, %v731_v53  ;;  %v5314_v34 = vld [vmem:[#allocation46_spill] sm:$0xff] }
 0x35f   : >> { %v4738_v49 = vpop.permute.xlu0 %2212  ;;  %v679_v11 = vadd.f32 %v5298_v22, %v5297_v7  ;;  %v734_v33 = vadd.f32 %v5307_v57, %v674_v37  ;;  %v5311_v22 = vld [vmem:[#allocation99_spill] sm:$0xff]  ;;  %v4794_v4 = vadd.f32 %v5314_v34, %v678_v44  ;;  %v5317_v37 = vld [vmem:[#allocation109_spill] sm:$0xff]  ;;  %v5322_v44 = vld [vmem:[#allocation30_spill] sm:$0xff] }
 0x360   : >> { %v793_v41 = vadd.f32 %v5311_v22, %v733_v30  ;;  %v850_v51 = vadd.f32 %v5312_v24, %v790_v25  ;;  %v851_v8 = vadd.f32 %v5313_v1, %v791_v40  ;;  %v5315_v53 = vld [vmem:[#allocation47_spill] sm:$0xff]  ;;  %v4803_v19 = vadd.f32 %v5317_v37, %v677_v43  ;;  %v5321_v40 = vld [vmem:[#allocation116_spill] sm:$0xff]  ;;  %v5323_v22 = vld [vmem:[#allocation118_spill] sm:$0xff] }
 0x361   : >> { %v4740_v0 = vpop.permute.xlu1 %1552  ;;  %v4797_v13 = vadd.f32 %v5315_v53, %v679_v11  ;;  %v5320_v25 = vld [vmem:[#allocation111_spill] sm:$0xff]  ;;  %v5324_v11 = vld [vmem:[#allocation32_spill] sm:$0xff]  ;;  %v5326_v34 = vld [vmem:[#allocation113_spill] sm:$0xff] }
 0x362   : >> { %5276 = vst [vmem:[#allocation167_spill] sm:$0xff] %v4740_v0  ;;  %v736_v0 = vadd.f32 %v5299_v62, %v676_v28  ;;  %v5310_v62 = vld [vmem:[#allocation98_spill] sm:$0xff]  ;;  %v4811_v9 = vadd.f32 %v5320_v25, %v735_v47  ;;  %v1376_v24 = vadd.f32 %v5324_v11, %v5323_v22  ;;  %v4819_v43 = vadd.f32 %v5326_v34, %v793_v41  ;;  %v5327_v53 = vld [vmem:[#allocation117_spill] sm:$0xff]  ;;  %v5332_v25 = vld [vmem:[#allocation120_spill] sm:$0xff] }
 0x363   : >> { %v4742_v60 = vpop.permute.xlu0 %2216  ;;  %v792_v28 = vadd.f32 %v5310_v62, %v732_v31  ;;  %v5319_v31 = vld [vmem:[#allocation110_spill] sm:$0xff]  ;;  %v2120_v62 = vadd.f32 %v5322_v44, %v5321_v40  ;;  %v5334_v44 = vld [vmem:[#allocation121_spill] sm:$0xff]  ;;  %v5338_v41 = vld [vmem:[#allocation123_spill] sm:$0xff] }
 0x364   : >> { %v4800_v57 = vadd.f32 %v5316_v12, %v736_v0  ;;  %v4808_v30 = vadd.f32 %v5319_v31, %v734_v33  ;;  %v5325_v0 = vld [vmem:[#allocation112_spill] sm:$0xff]  ;;  %v5328_v12 = vld [vmem:[#allocation31_spill] sm:$0xff]  ;;  %v5330_v31 = vld [vmem:[#allocation34_spill] sm:$0xff]  ;;  %v2123_v55 = vadd.f32 %v5335_v39, %v5334_v44 }
 0x365   : >> { %v4744_v18 = vpop.permute.xlu1 %2218  ;;  %v852_v1 = vadd.f32 %v5325_v0, %v792_v28  ;;  %v2121_v37 = vadd.f32 %v5328_v12, %v5327_v53  ;;  %v5329_v33 = vld [vmem:[#allocation119_spill] sm:$0xff]  ;;  %v5336_v22 = vld [vmem:[#allocation122_spill] sm:$0xff]  ;;  %v5341_v12 = vld [vmem:[#allocation125_spill] sm:$0xff] }
 0x366   : >> { %v2180_v11 = vadd.f32 %v5336_v22, %v2120_v62  ;;  %v5337_v28 = vld [vmem:[#allocation126_spill] sm:$0xff]  ;;  %v5347_v44 = vld [vmem:[#allocation129_spill] sm:$0xff]  ;;  %v5348_v62 = vld [vmem:[#allocation39_spill] sm:$0xff] }
 0x367   : >> { %v4746_v21 = vpop.permute.xlu0 %2220  ;;  %v1436_v0 = vadd.f32 %v5337_v28, %v1376_v24  ;;  %v2181_v34 = vadd.f32 %v5338_v41, %v2121_v37  ;;  %v2125_v22 = vadd.f32 %v5348_v62, %v5347_v44  ;;  %v5349_v24 = vld [vmem:[#allocation132_spill] sm:$0xff]  ;;  %v5351_v41 = vld [vmem:[#allocation131_spill] sm:$0xff] }
 0x368   : >> { %v2240_v37 = vadd.f32 %v5349_v24, %v2180_v11  ;;  %v5356_v11 = vld [vmem:[#allocation135_spill] sm:$0xff]  ;;  %v5357_v24 = vld [vmem:[#allocation42_spill] sm:$0xff] }
 0x369   : >> { %v4748_v32 = vpop.permute.xlu1 %2222  ;;  %v1496_v28 = vadd.f32 %v4427_v20, %v1436_v0  ;;  %v1381_v20 = vadd.f32 %v5357_v24, %v5356_v11  ;;  %v5358_v0 = vld [vmem:[#allocation137_spill] sm:$0xff] }
 0x36b   : >> { %v4750_v52 = vpop.permute.xlu0 %2224  ;;  %v1556_v44 = vadd.f32 %v4505_v54, %v1496_v28  ;;  %v5360_v54 = vld [vmem:[#allocation138_spill] sm:$0xff]  ;;  %v5361_v28 = vld [vmem:[#allocation141_spill] sm:$0xff] }
 0x36d   : >> { %v4752_v27 = vpop.permute.xlu1 %2226  ;;  %v1596_v11 = vadd.f32 %v1556_v44, %v850_v51  ;;  %v5371_v44 = vld [vmem:[#allocation140_spill] sm:$0xff] }
 0x36e   : >> { %5277 = vst [vmem:[#allocation168_spill] sm:$0xff] %v4752_v27 }
 0x36f   : >> { %v4762_v2 = vpop.permute.xlu0 %2228 }
 0x370   : >> { %5286 = vst [vmem:[#allocation60_spill] sm:$0xff] %v4762_v2  ;;  %v5353_v2 = vld [vmem:[#allocation133_spill] sm:$0xff] }
 0x371   : >> { %v4777_v35 = vpop.permute.xlu1 %2230  ;;  %v2241_v26 = vadd.f32 %v5353_v2, %v2181_v34  ;;  %v5359_v2 = vld [vmem:[#allocation41_spill] sm:$0xff] }
 0x372   : >> { %5300 = vst [vmem:[#allocation15_spill] sm:$0xff] %v4777_v35  ;;  %v5339_v35 = vld [vmem:[#allocation124_spill] sm:$0xff] }
 0x373   : >> { %v4787_v7 = vpop.permute.xlu0 %2232  ;;  %v1378_v53 = vadd.f32 %v5340_v61, %v5339_v35  ;;  %v5350_v61 = vld [vmem:[#allocation130_spill] sm:$0xff] }
 0x374   : >> { %5309 = vst [vmem:[#allocation61_spill] sm:$0xff] %v4787_v7  ;;  %v5333_v7 = vld [vmem:[#allocation33_spill] sm:$0xff] }
 0x375   : >> { %v4805_v48 = vpop.permute.xlu1 %2234  ;;  %v2122_v40 = vadd.f32 %v5333_v7, %v5332_v25  ;;  %v5345_v7 = vld [vmem:[#allocation128_spill] sm:$0xff]  ;;  %v5346_v25 = vld [vmem:[#allocation37_spill] sm:$0xff] }
 0x376   : >> { %5318 = vst [vmem:[#allocation17_spill] sm:$0xff] %v4805_v48  ;;  %v1377_v48 = vadd.f32 %v5330_v31, %v5329_v33  ;;  %v1379_v33 = vadd.f32 %v5342_v5, %v5341_v12  ;;  %v5343_v31 = vld [vmem:[#allocation127_spill] sm:$0xff]  ;;  %v2124_v39 = vadd.f32 %v5346_v25, %v5345_v7  ;;  %v2183_v5 = vadd.f32 %v5351_v41, %v2123_v55  ;;  %v5352_v12 = vld [vmem:[#allocation136_spill] sm:$0xff]  ;;  %v5354_v7 = vld [vmem:[#allocation134_spill] sm:$0xff] }
 0x377   : >> { %v4825_v47 = vpop.permute.xlu0 %2236  ;;  %v2182_v35 = vadd.f32 %v5350_v61, %v2122_v40  ;;  %v5355_v25 = vld [vmem:[#allocation40_spill] sm:$0xff]  ;;  %v5362_v41 = vld [vmem:[#allocation143_spill] sm:$0xff] }
 0x378   : >> { %5331 = vst [vmem:[#allocation70_spill] sm:$0xff] %v4825_v47  ;;  %v1437_v47 = vadd.f32 %v5343_v31, %v1377_v48  ;;  %v1438_v48 = vadd.f32 %v5352_v12, %v1378_v53  ;;  %v1380_v27 = vadd.f32 %v5355_v25, %v5354_v7  ;;  %v1439_v40 = vadd.f32 %v5358_v0, %v1379_v33  ;;  %v5363_v12 = vld [vmem:[#allocation146_spill] sm:$0xff]  ;;  %v5365_v7 = vld [vmem:[#allocation144_spill] sm:$0xff] }
 0x379   : >> { %v4839_v63 = vpop.permute.xlu1 %2238  ;;  %v2242_v34 = vadd.f32 %v4473_v56, %v2182_v35  ;;  %v2184_v61 = vadd.f32 %v5361_v28, %v2124_v39  ;;  %v2243_v33 = vadd.f32 %v5362_v41, %v2183_v5  ;;  %v5367_v35 = vld [vmem:[#allocation142_spill] sm:$0xff] }
 0x37a   : >> { %5344 = vst [vmem:[#allocation18_spill] sm:$0xff] %v4839_v63  ;;  %v1497_v31 = vadd.f32 %v4434_v50, %v1437_v47  ;;  %v1498_v55 = vadd.f32 %v4497_v45, %v1438_v48  ;;  %v2126_v47 = vadd.f32 %v5359_v2, %v4451_v16  ;;  %v1499_v45 = vadd.f32 %v5363_v12, %v1439_v40  ;;  %v5366_v16 = vld [vmem:[#allocation139_spill] sm:$0xff]  ;;  %v5369_v5 = vld [vmem:[#allocation154_spill] sm:$0xff] }
 0x37b   : >> { %v2261_v63 = vpop.permute.xlu0 %2260  ;;  %v1440_v25 = vadd.f32 %v5365_v7, %v1380_v27  ;;  %v5370_v40 = vld [vmem:[#allocation151_spill] sm:$0xff] }
 0x37c   : >> { %v2300_v62 = vadd.f32 %v2261_v63, %v2240_v37  ;;  %v1557_v53 = vadd.f32 %v4507_v6, %v1497_v31  ;;  %v5364_v6 = vld [vmem:[#allocation153_spill] sm:$0xff] }
 0x37d   : >> { %v2263_v50 = vpop.permute.xlu1 %2262  ;;  %v1558_v48 = vadd.f32 %v5364_v6, %v1498_v55  ;;  %v2244_v55 = vadd.f32 %v4730_v42, %v2184_v61  ;;  %v5376_v61 = vld [vmem:[#allocation50_spill] sm:$0xff] }
 0x37e   : >> { %v2340_v63 = vadd.f32 %v2300_v62, %v5360_v54  ;;  %v2301_v37 = vadd.f32 %v2263_v50, %v2241_v26  ;;  %v2185_v62 = vadd.f32 %v5367_v35, %v2125_v22  ;;  %v5368_v26 = vld [vmem:[#allocation145_spill] sm:$0xff]  ;;  %v1597_v39 = vadd.f32 %v1557_v53, %v851_v8  ;;  %v5374_v22 = vld [vmem:[#allocation152_spill] sm:$0xff]  ;;  %v5375_v53 = vld [vmem:[#allocation159_spill] sm:$0xff] }
 0x37f   : >> { %v2265_v31 = vpop.permute.xlu0 %2264  ;;  %v1441_v0 = vadd.f32 %v5368_v26, %v1381_v20  ;;  %v1559_v50 = vadd.f32 %v5369_v5, %v1499_v45  ;;  %v1500_v54 = vadd.f32 %v5370_v40, %v1440_v25  ;;  %v1598_v41 = vadd.f32 %v1558_v48, %v852_v1  ;;  %v5378_v25 = vld [vmem:[#allocation150_spill] sm:$0xff]  ;;  %v5379_v48 = vld [vmem:[#allocation160_spill] sm:$0xff]  ;;  %v5380_v35 = vld [vmem:[#allocation49_spill] sm:$0xff] }
 0x380   : >> { %2402 = vst [vmem:[%s4862_s18] sm:$0xff] %v2340_v63  ;;  %v2341_v24 = vadd.f32 %v2301_v37, %v5366_v16  ;;  %v2302_v56 = vadd.f32 %v2265_v31, %v2242_v34  ;;  %v5372_v63 = vld [vmem:[#allocation43_spill] sm:$0xff]  ;;  %v5373_v34 = vld [vmem:[#allocation149_spill] sm:$0xff]  ;;  %v2245_v45 = vadd.f32 %v4724_v38, %v2185_v62  ;;  %v797_v62 = vadd.f32 %v5380_v35, %v4803_v19 }
 0x381   : >> { %v2267_v2 = vpop.permute.xlu1 %2266  ;;  %v2127_v37 = vadd.f32 %v5372_v63, %v5371_v44  ;;  %v2186_v28 = vadd.f32 %v5373_v34, %v2126_v47  ;;  %v1501_v20 = vadd.f32 %v5374_v22, %v1441_v0  ;;  %v1560_v12 = vadd.f32 %v5375_v53, %v1500_v54  ;;  %v5377_v31 = vld [vmem:[#allocation147_spill] sm:$0xff]  ;;  %v5384_v54 = vld [vmem:[#allocation57_spill] sm:$0xff]  ;;  %v5388_v22 = vld [vmem:[#allocation56_spill] sm:$0xff] }
 0x382   : >> { %2403 = vst [vmem:[%s4862_s18 + $0x8] sm:$0xff] %v2341_v24  ;;  %v2342_v27 = vadd.f32 %v2302_v56, %v1596_v11  ;;  %v2303_v51 = vadd.f32 %v2267_v2, %v2243_v33  ;;  %v854_v33 = vadd.f32 %v5376_v61, %v4808_v30  ;;  %v2128_v7 = vadd.f32 %v3901_v23, %v5377_v31  ;;  %v5381_v30 = vld [vmem:[#allocation51_spill] sm:$0xff]  ;;  %v5382_v23 = vld [vmem:[#allocation148_spill] sm:$0xff]  ;;  %v5391_v53 = vld [vmem:[#allocation58_spill] sm:$0xff] }
 0x383   : >> { %v2269_v8 = vpop.permute.xlu0 %2268  ;;  %v2187_v47 = vadd.f32 %v5378_v25, %v2127_v37  ;;  %v1599_v11 = vadd.f32 %v1559_v50, %v4819_v43  ;;  %v1561_v16 = vadd.f32 %v5379_v48, %v1501_v20  ;;  %v2246_v24 = vadd.f32 %v4738_v49, %v2186_v28  ;;  %v5385_v19 = vld [vmem:[#allocation155_spill] sm:$0xff]  ;;  %v5389_v20 = vld [vmem:[#allocation156_spill] sm:$0xff]  ;;  %v5392_v61 = vld [vmem:[#allocation162_spill] sm:$0xff] }
 0x384   : >> { %2404 = vst [vmem:[%s4862_s18 + $0x10] sm:$0xff] %v2342_v27  ;;  %v2343_v6 = vadd.f32 %v2303_v51, %v1597_v39  ;;  %v2304_v42 = vadd.f32 %v2269_v8, %v2244_v55  ;;  %v855_v26 = vadd.f32 %v5381_v30, %v4811_v9  ;;  %v2129_v0 = vadd.f32 %v3905_v29, %v5382_v23  ;;  %v5383_v39 = vld [vmem:[#allocation157_spill] sm:$0xff]  ;;  %v5386_v9 = vld [vmem:[#allocation158_spill] sm:$0xff]  ;;  %v5387_v29 = vld [vmem:[#allocation59_spill] sm:$0xff] }
 0x385   : >> { %v2271_v1 = vpop.permute.xlu1 %2270  ;;  %v2188_v43 = vadd.f32 %v5383_v39, %v2128_v7  ;;  %v1600_v50 = vadd.f32 %v1560_v12, %v854_v33  ;;  %v2247_v2 = vadd.f32 %v4736_v36, %v2187_v47  ;;  %v798_v55 = vadd.f32 %v5384_v54, %v4794_v4  ;;  %v5393_v31 = vld [vmem:[#allocation68_spill] sm:$0xff]  ;;  %v5396_v48 = vld [vmem:[#allocation69_spill] sm:$0xff] }
 0x386   : >> { %2405 = vst [vmem:[%s4862_s18 + $0x18] sm:$0xff] %v2343_v6  ;;  %v2344_v38 = vadd.f32 %v2304_v42, %v1598_v41  ;;  %v2305_v56 = vadd.f32 %v2271_v1, %v2245_v45  ;;  %v2130_v27 = vadd.f32 %v3943_v10, %v5385_v19  ;;  %v2189_v51 = vadd.f32 %v5386_v9, %v2129_v0  ;;  %v5390_v41 = vld [vmem:[#allocation161_spill] sm:$0xff]  ;;  %v5395_v1 = vld [vmem:[#allocation12_spill] sm:$0xff] }
 0x387   : >> { %v2273_v5 = vpop.permute.xlu0 %2272  ;;  %v856_v44 = vadd.f32 %v5387_v29, %v4800_v57  ;;  %v1601_v37 = vadd.f32 %v1561_v16, %v855_v26  ;;  %v2248_v34 = vadd.f32 %v4742_v60, %v2188_v43  ;;  %v799_v4 = vadd.f32 %v5388_v22, %v4797_v13  ;;  %v5399_v26 = vld [vmem:[#allocation64_spill] sm:$0xff]  ;;  %v5405_v29 = vld [vmem:[#allocation63_spill] sm:$0xff] }
 0x388   : >> { %2406 = vst [vmem:[%s4862_s18 + $0x20] sm:$0xff] %v2344_v38  ;;  %v2345_v49 = vadd.f32 %v2305_v56, %v1599_v11  ;;  %v2306_v40 = vadd.f32 %v2273_v5, %v2246_v24  ;;  %v2131_v10 = vadd.f32 %v3949_v15, %v5389_v20  ;;  %v2190_v8 = vadd.f32 %v5390_v41, %v2130_v27  ;;  %v5404_v27 = vld [vmem:[#allocation168_spill] sm:$0xff] }
 0x389   : >> { %v2275_v63 = vpop.permute.xlu1 %2274  ;;  %v857_v12 = vadd.f32 %v5391_v53, %v797_v62  ;;  %v1602_v57 = vadd.f32 %v4624_v17, %v856_v44  ;;  %v2249_v6 = vadd.f32 %v4744_v18, %v2189_v51  ;;  %v858_v13 = vadd.f32 %v5393_v31, %v798_v55  ;;  %v5394_v17 = vld [vmem:[#allocation53_spill] sm:$0xff]  ;;  %v5397_v62 = vld [vmem:[#allocation52_spill] sm:$0xff]  ;;  %v5403_v55 = vld [vmem:[#allocation78_spill] sm:$0xff] }
 0x38a   : >> { %2407 = vst [vmem:[%s4862_s18 + $0x28] sm:$0xff] %v2345_v49  ;;  %v2346_v36 = vadd.f32 %v2306_v40, %v1600_v50  ;;  %v2307_v28 = vadd.f32 %v2275_v63, %v2247_v2  ;;  %v2191_v33 = vadd.f32 %v5392_v61, %v2131_v10  ;;  %v2250_v25 = vadd.f32 %v4746_v21, %v2190_v8  ;;  %v5398_v21 = vld [vmem:[#allocation13_spill] sm:$0xff]  ;;  %v5401_v50 = vld [vmem:[#allocation14_spill] sm:$0xff]  ;;  %v5407_v44 = vld [vmem:[#allocation76_spill] sm:$0xff] }
 0x38b   : >> { %v2277_v45 = vpop.permute.xlu0 %2276  ;;  %v1603_v15 = vadd.f32 %v4628_v14, %v857_v12  ;;  %v682_v18 = vadd.f32 %v5395_v1, %v5394_v17  ;;  %v859_v16 = vadd.f32 %v5396_v48, %v799_v4  ;;  %v1604_v38 = vadd.f32 %v4660_v46, %v858_v13  ;;  %v5402_v49 = vld [vmem:[#allocation65_spill] sm:$0xff]  ;;  %v5410_v4 = vld [vmem:[#allocation163_spill] sm:$0xff]  ;;  %v5411_v20 = vld [vmem:[#allocation60_spill] sm:$0xff] }
 0x38c   : >> { %2408 = vst [vmem:[%s4862_s18 + $0x30] sm:$0xff] %v2346_v36  ;;  %v2347_v60 = vadd.f32 %v2307_v28, %v1601_v37  ;;  %v2308_v42 = vadd.f32 %v2277_v45, %v2248_v34  ;;  %v2251_v56 = vadd.f32 %v4748_v32, %v2191_v33  ;;  %v683_v30 = vadd.f32 %v5398_v21, %v5397_v62  ;;  %v5400_v32 = vld [vmem:[#allocation62_spill] sm:$0xff]  ;;  %v5408_v37 = vld [vmem:[#allocation79_spill] sm:$0xff]  ;;  %v5409_v28 = vld [vmem:[#allocation92_spill] sm:$0xff] }
 0x38d   : >> { %v2279_v7 = vpop.permute.xlu1 %2278  ;;  %v742_v23 = vadd.f32 %v5399_v26, %v682_v18  ;;  %v1605_v39 = vadd.f32 %v4664_v59, %v859_v16  ;;  %v2252_v43 = vadd.f32 %v4750_v52, %v4638_v3  ;;  %v684_v2 = vadd.f32 %v5401_v50, %v5400_v32  ;;  %v5406_v3 = vld [vmem:[#allocation16_spill] sm:$0xff]  ;;  %v5414_v12 = vld [vmem:[#allocation19_spill] sm:$0xff]  ;;  %v5417_v61 = vld [vmem:[#allocation93_spill] sm:$0xff] }
 0x38e   : >> { %2409 = vst [vmem:[%s4862_s18 + $0x38] sm:$0xff] %v2347_v60  ;;  %v2348_v47 = vadd.f32 %v2308_v42, %v1602_v57  ;;  %v2309_v11 = vadd.f32 %v2279_v7, %v2249_v6  ;;  %v743_v40 = vadd.f32 %v5402_v49, %v683_v30  ;;  %v2253_v9 = vadd.f32 %v5404_v27, %v4642_v58  ;;  %v5412_v41 = vld [vmem:[#allocation44_spill] sm:$0xff]  ;;  %v5415_v57 = vld [vmem:[#allocation77_spill] sm:$0xff]  ;;  %v5416_v60 = vld [vmem:[#allocation90_spill] sm:$0xff] }
 0x38f   : >> { %v2281_v24 = vpop.permute.xlu0 %2280  ;;  %v802_v19 = vadd.f32 %v5403_v55, %v742_v23  ;;  %v685_v52 = vadd.f32 %v5406_v3, %v5405_v29  ;;  %v744_v63 = vadd.f32 %v5407_v44, %v684_v2  ;;  %v2254_v10 = vadd.f32 %v5411_v20, %v5410_v4  ;;  %v5413_v53 = vld [vmem:[#allocation72_spill] sm:$0xff]  ;;  %v5418_v13 = vld [vmem:[#allocation55_spill] sm:$0xff]  ;;  %v5422_v18 = vld [vmem:[#allocation73_spill] sm:$0xff] }
 0x390   : >> { %2410 = vst [vmem:[%s4862_s18 + $0x40] sm:$0xff] %v2348_v47  ;;  %v2349_v35 = vadd.f32 %v2309_v11, %v1603_v15  ;;  %v2310_v14 = vadd.f32 %v2281_v24, %v2250_v25  ;;  %v803_v34 = vadd.f32 %v5408_v37, %v743_v40  ;;  %v686_v45 = vadd.f32 %v5414_v12, %v5413_v53  ;;  %v5419_v15 = vld [vmem:[#allocation164_spill] sm:$0xff]  ;;  %v5420_v25 = vld [vmem:[#allocation15_spill] sm:$0xff]  ;;  %v5423_v48 = vld [vmem:[#allocation21_spill] sm:$0xff] }
 0x391   : >> { %v2283_v0 = vpop.permute.xlu1 %2282  ;;  %v862_v22 = vadd.f32 %v5409_v28, %v802_v19  ;;  %v745_v6 = vadd.f32 %v5415_v57, %v685_v52  ;;  %v804_v42 = vadd.f32 %v5416_v60, %v744_v63  ;;  %v2255_v47 = vadd.f32 %v5420_v25, %v5419_v15  ;;  %v5421_v11 = vld [vmem:[#allocation28_spill] sm:$0xff]  ;;  %v5424_v24 = vld [vmem:[#allocation86_spill] sm:$0xff]  ;;  %v5428_v23 = vld [vmem:[#allocation45_spill] sm:$0xff] }
 0x392   : >> { %2411 = vst [vmem:[%s4862_s18 + $0x48] sm:$0xff] %v2349_v35  ;;  %v2350_v5 = vadd.f32 %v2310_v14, %v1604_v38  ;;  %v2311_v46 = vadd.f32 %v2283_v0, %v2251_v56  ;;  %v863_v33 = vadd.f32 %v5417_v61, %v803_v34  ;;  %v687_v16 = vadd.f32 %v5423_v48, %v5422_v18  ;;  %v5425_v56 = vld [vmem:[#allocation91_spill] sm:$0xff]  ;;  %v5426_v14 = vld [vmem:[#allocation104_spill] sm:$0xff]  ;;  %v5427_v30 = vld [vmem:[#allocation54_spill] sm:$0xff] }
 0x393   : >> { %v2285_v54 = vpop.permute.xlu0 %2284  ;;  %v1608_v7 = vadd.f32 %v5418_v13, %v862_v22  ;;  %v746_v38 = vadd.f32 %v5424_v24, %v686_v45  ;;  %v805_v35 = vadd.f32 %v5425_v56, %v745_v6  ;;  %v864_v62 = vadd.f32 %v5426_v14, %v804_v42  ;;  %v5429_v0 = vld [vmem:[#allocation61_spill] sm:$0xff]  ;;  %v5431_v50 = vld [vmem:[#allocation100_spill] sm:$0xff]  ;;  %v5437_v44 = vld [vmem:[#allocation114_spill] sm:$0xff] }
 0x394   : >> { %2412 = vst [vmem:[%s4862_s18 + $0x50] sm:$0xff] %v2350_v5  ;;  %v2351_v59 = vadd.f32 %v2311_v46, %v1605_v39  ;;  %v2312_v51 = vadd.f32 %v2285_v54, %v2252_v43  ;;  %v1609_v26 = vadd.f32 %v5427_v30, %v863_v33  ;;  %v2256_v39 = vadd.f32 %v5429_v0, %v5428_v23  ;;  %v5430_v46 = vld [vmem:[#allocation87_spill] sm:$0xff]  ;;  %v5432_v49 = vld [vmem:[#allocation105_spill] sm:$0xff]  ;;  %v5433_v55 = vld [vmem:[#allocation80_spill] sm:$0xff] }
 0x395   : >> { %v2287_v36 = vpop.permute.xlu1 %2286  ;;  %v747_v32 = vadd.f32 %v5430_v46, %v687_v16  ;;  %v806_v2 = vadd.f32 %v5431_v50, %v746_v38  ;;  %v865_v40 = vadd.f32 %v5432_v49, %v805_v35  ;;  %v1610_v19 = vadd.f32 %v5433_v55, %v864_v62  ;;  %v5434_v27 = vld [vmem:[#allocation29_spill] sm:$0xff]  ;;  %v5440_v22 = vld [vmem:[#allocation167_spill] sm:$0xff]  ;;  %v5441_v20 = vld [vmem:[#allocation66_spill] sm:$0xff] }
 0x396   : >> { %2413 = vst [vmem:[%s4862_s18 + $0x58] sm:$0xff] %v2351_v59  ;;  %v2352_v58 = vadd.f32 %v2312_v51, %v5412_v41  ;;  %v2313_v8 = vadd.f32 %v2287_v36, %v2253_v9  ;;  %v5435_v9 = vld [vmem:[#allocation17_spill] sm:$0xff]  ;;  %v5443_v53 = vld [vmem:[#allocation115_spill] sm:$0xff]  ;;  %v5444_v57 = vld [vmem:[#allocation166_spill] sm:$0xff] }
 0x397   : >> { %v2289_v31 = vpop.permute.xlu0 %2288  ;;  %v2257_v59 = vadd.f32 %v5435_v9, %v5434_v27  ;;  %v5436_v3 = vld [vmem:[#allocation101_spill] sm:$0xff]  ;;  %v866_v63 = vadd.f32 %v5437_v44, %v806_v2  ;;  %v5445_v60 = vld [vmem:[#allocation67_spill] sm:$0xff]  ;;  %v5446_v42 = vld [vmem:[#allocation18_spill] sm:$0xff] }
 0x398   : >> { %2414 = vst [vmem:[%s4862_s18 + $0x60] sm:$0xff] %v2352_v58  ;;  %v2353_v17 = vadd.f32 %v2313_v8, %v5421_v11  ;;  %v2314_v1 = vadd.f32 %v2289_v31, %v2254_v10  ;;  %v807_v52 = vadd.f32 %v5436_v3, %v747_v32  ;;  %v5438_v37 = vld [vmem:[#allocation165_spill] sm:$0xff]  ;;  %v5442_v10 = vld [vmem:[#allocation70_spill] sm:$0xff]  ;;  %v2259_v61 = vadd.f32 %v5446_v42, %v5445_v60 }
 0x399   : >> { %v2291_v21 = vpop.permute.xlu1 %2290  ;;  %v1611_v34 = vadd.f32 %v5438_v37, %v865_v40  ;;  %v5439_v28 = vld [vmem:[#allocation81_spill] sm:$0xff]  ;;  %v2258_v41 = vadd.f32 %v5442_v10, %v5441_v20  ;;  %v1612_v6 = vadd.f32 %v5444_v57, %v866_v63 }
 0x39a   : >> { %2415 = vst [vmem:[%s4862_s18 + $0x68] sm:$0xff] %v2353_v17  ;;  %v2354_v43 = vadd.f32 %v2314_v1, %v1608_v7  ;;  %v2315_v5 = vadd.f32 %v2291_v21, %v2255_v47  ;;  %v1573_v4 = vadd.f32 %v5440_v22, %v5439_v28  ;;  %v867_v12 = vadd.f32 %v5443_v53, %v807_v52 }
 0x39b   : >> { %v2293_v54 = vpop.permute.xlu0 %2292 }
 0x39c   : >> { %2416 = vst [vmem:[%s4862_s18 + $0x70] sm:$0xff] %v2354_v43  ;;  %v2355_v51 = vadd.f32 %v2315_v5, %v1609_v26  ;;  %v2316_v29 = vadd.f32 %v2293_v54, %v2256_v39  ;;  %v1613_v7 = vadd.f32 %v1573_v4, %v867_v12 }
 0x39d   : >> { %v2295_v36 = vpop.permute.xlu1 %2294 }
 0x39e   : >> { %2417 = vst [vmem:[%s4862_s18 + $0x78] sm:$0xff] %v2355_v51  ;;  %v2356_v58 = vadd.f32 %v2316_v29, %v1610_v19  ;;  %v2317_v8 = vadd.f32 %v2295_v36, %v2257_v59 }
 0x39f   : >> { %v2297_v45 = vpop.permute.xlu0 %2296 }
 0x3a0   : >> { %2418 = vst [vmem:[%s4862_s18 + $0x80] sm:$0xff] %v2356_v58  ;;  %v2357_v33 = vadd.f32 %v2317_v8, %v1611_v34  ;;  %v2318_v31 = vadd.f32 %v2297_v45, %v2258_v41  ;;  %182 = sbr.rel (!%p180_p4) target bundleno = 89 (0x59), region = 90 }
 0x3a1   : >> { %v2299_v13 = vpop.permute.xlu1 %2298 }
 0x3a2   : >> { %2419 = vst [vmem:[%s4862_s18 + $0x88] sm:$0xff] %v2357_v33  ;;  %v2358_v15 = vadd.f32 %v2318_v31, %v1612_v6  ;;  %v2319_v25 = vadd.f32 %v2299_v13, %v2259_v61 }
 0x3a4   : >> { %2420 = vst [vmem:[%s4862_s18 + $0x90] sm:$0xff] %v2358_v15  ;;  %v2359_v47 = vadd.f32 %v2319_v25, %v1613_v7 }
 0x3a6   : >> { %2421 = vst [vmem:[%s4862_s18 + $0x98] sm:$0xff] %v2359_v47 }
 0x3a7   : > { %3375 = shalt.err (!%p3372_p9)
}
 0x3a8   : > { %s3376_s27 = scalar_lea.hbm %s5008_s29, 17920  ;;  %s3380_s28 = scalar_lea.hbm %s5056_s2, 35840 }
 0x3a9   : > { %p3377_p2 = scmp.ne.s32.totalorder %s5008_s29, %s3376_s27  ;;  %p3381_p11 = scmp.lt.u32.totalorder %s5008_s29, %s5056_s2 }
 0x3aa   : > { %p3382_p1 = scmp.lt.u32.totalorder %s3380_s28, %s3376_s27  ;;  %p3384_p6 = scmp.lt.u32.totalorder %s3376_s27, %s5008_s29 }
 0x3ab   : > { %p3378_p0 = pnand %p3377_p2, %p3561_p12 }
 0x3ac   : > { %p3383_p4 = por %p3382_p1, %p3381_p11 }
 0x3ad   : > { %p3379_p5 = pneg %p3378_p0 }
 0x3ae   : > { %p3385_p8 = por %p3384_p6, %p3383_p4 }
 0x3b0   : > { %p3386_p10 = pnand %p3385_p8, %p3379_p5 }
 0x3b2   : > { %3389 = shalt.err (!%p3386_p10)
}
 0x3b3   : > { %s3453_s6 = smov 128   ;;  %s3454_s7 = smov 8  }
 0x3b4   : > { %3061 = dma.vmem_to_hbm [thread:$0]  (%p3561_p12), %s5010_s25, 17920, %s5008_s29, %s2423_s30, %s3453_s6, %s3453_s6, %s3454_s7  }
 0x3b5 PF: > { %s2451_s18 = sand.u32 1, %s3424_s9   ;;  %p5447_p13 = scmp.ne.s32.totalorder %s5091_s16, 0 }
 0x3b6   : > { %p5448_p3 = scmp.ge.s32.totalorder %s3436_s12, 2  ;;  %s2452_s24 = scalar_lea.sflag [#allocation5], %s2451_s18 }
 0x3b8   : > { %p3072_p7 = pnand %p5448_p3, %p5447_p13 }
 0x3ba   : > { %3419 = dma.done.wait (!%p3072_p7), %s2452_s24, 17920  }
 0x3bb   : > { %3421 = vsyncadd (!%p3072_p7), %s2452_s24, 4294949376  ;;  %p16_p9 = scmp.ge.s32.totalorder %s3526_s21, 4   ;;  %s5449_s9 = smov %s3428_s10 }
 0x3bc   : > { %s5450_s10 = smov %s3432_s11  ;;  %s5451_s11 = smov %s3557_s8 }
 0x3bd   : > { %s5452_s12 = smov %s3526_s21  ;;  %18 = sbr.rel (!%p16_p9) target bundleno = 6 (0x6), region = 101 }
 0x3c4   :  { %2457 = vsyncpa [#allocation4], 1 }
 0x3c5   :  { %2459 = vsyncpa [#allocation4 + $0x1], 1 }
 0x3c6   :  { %2460 = vsyncpa [#allocation7], 1 }
 0x3c7   :  { %2461 = vsyncpa [#allocation5], 1 }
 0x3c8   :  { %2463 = vsyncpa [#allocation5 + $0x1], 1 }

</bundles_post_ra>
